<compile_context>
chip_gen: v6e
topology: v6e:2x2x1
jax: 0.10.0
libtpu: 0.0.40
codegen_flags: <defaults>
</compile_context>

<pallas_src>
import functools

import jax
import jax.numpy as jnp
from jax import lax
from jax.experimental import pallas as pl
from jax.experimental.pallas import tpu as pltpu


# --------------------------------------------------------------------------
# Single fused kernel: gather + 2-layer LSTM + Linear/ReLU/LogSoftmax
# --------------------------------------------------------------------------
def _fused_rnn_kernel(sent_ref,                       # (Sp,)  int32  SMEM
                      emb_ref,                        # (V,Ep) f32    VMEM
                      wih1_ref, whh1_ref, b1_ref,     # (Ep,4H),(H,4H),(1,4H)
                      wih2_ref, whh2_ref, b2_ref,     # (H,4H),(H,4H),(1,4H)
                      fcw_ref, fcb_ref,               # (H,Vp),(1,Vp)
                      out_ref,                        # (Sp,Vp) f32
                      x_sc, h1_sc, h2_sc,             # VMEM scratch
                      *, vocab):                      # real (unpadded) vocab size
    seq_len = out_ref.shape[0]                        # padded to multiple of 8
    hidden = whh1_ref.shape[0]

    # ---- 1) embedding gather: indices from SMEM, rows from the VMEM table ----
    # (each row is Ep = multiple-of-128 lanes -> unmasked load/store)
    for t in range(seq_len):
        x_sc[pl.ds(t, 1), :] = emb_ref[pl.ds(sent_ref[t], 1), :]

    # ---- gate combine (PyTorch order i, f, g, o) ------------------------------
    def combine(gates, c):
        # two full-vreg EUP pushes over the whole (1, 4H) gate row; per-gate
        # extraction below is a static lane slice.
        sig = jax.nn.sigmoid(gates)
        th = jnp.tanh(gates)
        i = sig[:, 0 * hidden:1 * hidden]
        f = sig[:, 1 * hidden:2 * hidden]
        g = th[:, 2 * hidden:3 * hidden]
        o = sig[:, 3 * hidden:4 * hidden]
        c_new = f * c + i * g
        h_new = o * jnp.tanh(c_new)
        return h_new, c_new

    zeros = jnp.zeros((1, hidden), jnp.float32)

    # ---- 2) layer 1: batched input projection, then unrolled recurrence ------
    g1 = (jnp.dot(x_sc[...], wih1_ref[...], preferred_element_type=jnp.float32)
          + b1_ref[...])
    whh1 = whh1_ref[...]
    h1, c1 = zeros, zeros
    for t in range(seq_len):
        gates = g1[t:t + 1, :] + jnp.dot(h1, whh1,
                                         preferred_element_type=jnp.float32)
        h1, c1 = combine(gates, c1)
        h1_sc[pl.ds(t, 1), :] = h1

    # ---- 3) layer 2: batched input projection, then unrolled recurrence ------
    g2 = (jnp.dot(h1_sc[...], wih2_ref[...], preferred_element_type=jnp.float32)
          + b2_ref[...])
    whh2 = whh2_ref[...]
    h2, c2 = zeros, zeros
    for t in range(seq_len):
        gates = g2[t:t + 1, :] + jnp.dot(h2, whh2,
                                         preferred_element_type=jnp.float32)
        h2, c2 = combine(gates, c2)
        h2_sc[pl.ds(t, 1), :] = h2

    # ---- 4) head: Linear -> ReLU -> LogSoftmax (fused, lane-dense output) ----
    logits = (jnp.dot(h2_sc[...], fcw_ref[...], preferred_element_type=jnp.float32)
              + fcb_ref[...])
    r = jnp.maximum(logits, 0.0)                      # F.relu
    if vocab != r.shape[1]:
        # mask padded vocab lanes out of the softmax normalization
        lane = lax.broadcasted_iota(jnp.int32, r.shape, 1)
        r = jnp.where(lane < vocab, r, jnp.float32(-1e30))
    m = jnp.max(r, axis=-1, keepdims=True)            # stable log-softmax
    s = r - m
    lse = jnp.log(jnp.sum(jnp.exp(s), axis=-1, keepdims=True))
    out_ref[...] = s - lse                            # (Sp, Vp): unmasked full-vreg stores


def _round_up(n, m):
    return ((n + m - 1) // m) * m


def rnn_model_forward(params, sentence, is_test=False):
    emb = params["embedding"]
    vocab, emb_dim = emb.shape
    hidden = params["whh1_t"].shape[0]
    sentence = sentence.reshape(-1).astype(jnp.int32)   # .view(1, -1, E): batch=1
    seq_len = sentence.shape[0]

    # lane/sublane-aligned kernel-side shapes (sliced back below)
    sp = _round_up(seq_len, 8)       # output rows -> multiple of 8 sublanes
    vp = _round_up(vocab, 128)       # output / fc width -> multiple of 128 lanes
    ep = _round_up(emb_dim, 128)     # gathered-embedding width -> 128 lanes

    sent_p = jnp.pad(sentence, (0, sp - seq_len))                       # pad with idx 0
    emb_p = jnp.pad(emb, ((0, 0), (0, ep - emb_dim)))
    wih1_p = jnp.pad(params["wih1_t"], ((0, ep - emb_dim), (0, 0)))     # zero rows
    fcw_p = jnp.pad(params["fc_w_t"], ((0, 0), (0, vp - vocab)))
    fcb_p = jnp.pad(params["fc_b"].reshape(1, -1), ((0, 0), (0, vp - vocab)))

    smem = pl.BlockSpec(memory_space=pltpu.MemorySpace.SMEM)
    vmem = pl.BlockSpec(memory_space=pltpu.MemorySpace.VMEM)

    out = pl.pallas_call(
        functools.partial(_fused_rnn_kernel, vocab=vocab),
        out_shape=jax.ShapeDtypeStruct((sp, vp), jnp.float32),
        in_specs=[smem] + [vmem] * 9,
        out_specs=vmem,
        scratch_shapes=[
            pltpu.VMEM((sp, ep), jnp.float32),       # gathered embeddings (lane-dense)
            pltpu.VMEM((sp, hidden), jnp.float32),   # layer-1 hidden states
            pltpu.VMEM((sp, hidden), jnp.float32),   # layer-2 hidden states
        ],
    )(sent_p, emb_p,
      params["wih1_t"] if ep == emb_dim else wih1_p,
      params["whh1_t"], params["b1"],
      params["wih2_t"], params["whh2_t"], params["b2"],
      fcw_p, fcb_p) if False else pl.pallas_call(
        functools.partial(_fused_rnn_kernel, vocab=vocab),
        out_shape=jax.ShapeDtypeStruct((sp, vp), jnp.float32),
        in_specs=[smem] + [vmem] * 9,
        out_specs=vmem,
        scratch_shapes=[
            pltpu.VMEM((sp, ep), jnp.float32),
            pltpu.VMEM((sp, hidden), jnp.float32),
            pltpu.VMEM((sp, hidden), jnp.float32),
        ],
    )(sent_p, emb_p,
      wih1_p, params["whh1_t"], params["b1"],
      params["wih2_t"], params["whh2_t"], params["b2"],
      fcw_p, fcb_p)

    out = out[:seq_len, :vocab]      # drop padded rows / lanes
    if is_test:
        out = out[-1:, :]
    return out


# --------------------------------------------------------------------------
# Parameter init (deterministic, mirrors the PyTorch module's init scheme)
# --------------------------------------------------------------------------
def init_params(key, vocab_len, embedding_dim, hidden):
    ks = jax.random.split(key, 11)
    u = lambda k, shape, lo, hi: jax.random.uniform(
        k, shape, jnp.float32, minval=lo, maxval=hi)

    # nn.Embedding weight copied from uniform(-1, 1)
    embedding = u(ks[0], (vocab_len, embedding_dim), -1.0, 1.0)

    # nn.LSTM default init: uniform(-1/sqrt(H), 1/sqrt(H))
    kk = 1.0 / jnp.sqrt(hidden)
    wih1 = u(ks[1], (4 * hidden, embedding_dim), -kk, kk)
    whh1 = u(ks[2], (4 * hidden, hidden), -kk, kk)
    bih1 = u(ks[3], (4 * hidden,), -kk, kk)
    bhh1 = u(ks[4], (4 * hidden,), -kk, kk)
    wih2 = u(ks[5], (4 * hidden, hidden), -kk, kk)
    whh2 = u(ks[6], (4 * hidden, hidden), -kk, kk)
    bih2 = u(ks[7], (4 * hidden,), -kk, kk)
    bhh2 = u(ks[8], (4 * hidden,), -kk, kk)

    # nn.Linear via weights_init: Xavier-uniform weight, zero bias
    w_bound = jnp.sqrt(6.0 / (hidden + vocab_len))
    fc_w = u(ks[9], (vocab_len, hidden), -w_bound, w_bound)
    fc_b = jnp.zeros((vocab_len,), jnp.float32)

    return {
        "embedding": embedding,
        "wih1_t": wih1.T, "whh1_t": whh1.T, "b1": (bih1 + bhh1).reshape(1, -1),
        "wih2_t": wih2.T, "whh2_t": whh2.T, "b2": (bih2 + bhh2).reshape(1, -1),
        "fc_w_t": fc_w.T, "fc_b": fc_b,
    }


# --------------------------------------------------------------------------
# Pure-JAX reference (correctness check only)
# --------------------------------------------------------------------------
def reference_forward(params, sentence):
    emb_dim = params["embedding"].shape[1]
    hidden = params["whh1_t"].shape[0]
    x = jnp.take(params["embedding"], sentence.reshape(-1), axis=0)
    x = x.reshape(-1, emb_dim).astype(jnp.float32)

    def cell(x_t, h, c, wih_t, whh_t, b):
        g = x_t @ wih_t + h @ whh_t + b
        i = jax.nn.sigmoid(g[:, 0 * hidden:1 * hidden])
        f = jax.nn.sigmoid(g[:, 1 * hidden:2 * hidden])
        gg = jnp.tanh(g[:, 2 * hidden:3 * hidden])
        o = jax.nn.sigmoid(g[:, 3 * hidden:4 * hidden])
        c = f * c + i * gg
        h = o * jnp.tanh(c)
        return h, c

    def step(carry, x_t):
        h1, c1, h2, c2 = carry
        h1, c1 = cell(x_t[None, :], h1, c1, params["wih1_t"], params["whh1_t"], params["b1"])
        h2, c2 = cell(h1, h2, c2, params["wih2_t"], params["whh2_t"], params["b2"])
        return (h1, c1, h2, c2), h2[0]

    z = jnp.zeros((1, hidden), jnp.float32)
    _, hs = lax.scan(step, (z, z, z, z), x)
    logits = hs @ params["fc_w_t"] + params["fc_b"][None, :]
    r = jnp.maximum(logits, 0.0)
    return jax.nn.log_softmax(r, axis=-1)


if __name__ == "__main__":
    batch_sz = 1
    vocab_len = 64
    embedding_dim = 32
    lstm_hidden_dim = 32
    seq_len = 8

    key = jax.random.PRNGKey(0)
    pkey, skey = jax.random.split(key)
    params = init_params(pkey, vocab_len, embedding_dim, lstm_hidden_dim)
    sentence = jax.random.randint(skey, (seq_len,), 0, vocab_len, dtype=jnp.int32)

    out = rnn_model_forward(params, sentence)
    out = jax.block_until_ready(out)

    ref = reference_forward(params, sentence)
    assert out.shape == (seq_len, vocab_len), out.shape
    assert out.dtype == jnp.float32
    assert jnp.allclose(out, ref, atol=1e-4, rtol=1e-4), float(jnp.max(jnp.abs(out - ref)))

    # also exercise the is_test path (last-row prediction)
    pred = jax.block_until_ready(rnn_model_forward(params, sentence, is_test=True))
    assert pred.shape == (1, vocab_len)

    print("KERNEL_OK")
</pallas_src>

<mosaic_0001>
module attributes {stable_mosaic.version = 11 : i64} {
  func.func @_fused_rnn_kernel(%arg0: memref<8xi32, #tpu.memory_space<smem>>, %arg1: memref<64x128xf32, #tpu.memory_space<vmem>>, %arg2: memref<128x128xf32, #tpu.memory_space<vmem>>, %arg3: memref<32x128xf32, #tpu.memory_space<vmem>>, %arg4: memref<1x128xf32, #tpu.memory_space<vmem>>, %arg5: memref<32x128xf32, #tpu.memory_space<vmem>>, %arg6: memref<32x128xf32, #tpu.memory_space<vmem>>, %arg7: memref<1x128xf32, #tpu.memory_space<vmem>>, %arg8: memref<32x128xf32, #tpu.memory_space<vmem>>, %arg9: memref<1x128xf32, #tpu.memory_space<vmem>>, %arg10: memref<8x128xf32, #tpu.memory_space<vmem>>, %arg11: memref<8x128xf32, #tpu.memory_space<vmem>>, %arg12: memref<8x32xf32, #tpu.memory_space<vmem>>, %arg13: memref<8x32xf32, #tpu.memory_space<vmem>>) attributes {dimension_semantics = [], scalar_prefetch = 0 : i64, scratch_operands = 3 : i64, tpu.core_type = #tpu.core_type<tc>} {
    %c0 = arith.constant 0 : index
    %0 = memref.load %arg0[%c0] : memref<8xi32, #tpu.memory_space<smem>>
    %1 = arith.index_cast %0 : i32 to index
    %c0_0 = arith.constant 0 : index
    %2 = vector.load %arg1[%1, %c0_0] : memref<64x128xf32, #tpu.memory_space<vmem>>, vector<1x128xf32>
    %c0_1 = arith.constant 0 : index
    %c0_2 = arith.constant 0 : index
    %3 = vector.load %arg11[%c0_1, %c0_2] : memref<8x128xf32, #tpu.memory_space<vmem>>, vector<1x128xf32>
    tpu.vector_store %arg11[%c0_1, %c0_2], %2 {strides = array<i32>} : memref<8x128xf32, #tpu.memory_space<vmem>>, vector<1x128xf32>,
    %c1 = arith.constant 1 : index
    %4 = memref.load %arg0[%c1] : memref<8xi32, #tpu.memory_space<smem>>
    %5 = arith.index_cast %4 : i32 to index
    %c0_3 = arith.constant 0 : index
    %6 = vector.load %arg1[%5, %c0_3] : memref<64x128xf32, #tpu.memory_space<vmem>>, vector<1x128xf32>
    %c1_4 = arith.constant 1 : index
    %c0_5 = arith.constant 0 : index
    %7 = vector.load %arg11[%c1_4, %c0_5] : memref<8x128xf32, #tpu.memory_space<vmem>>, vector<1x128xf32>
    tpu.vector_store %arg11[%c1_4, %c0_5], %6 {strides = array<i32>} : memref<8x128xf32, #tpu.memory_space<vmem>>, vector<1x128xf32>,
    %c2 = arith.constant 2 : index
    %8 = memref.load %arg0[%c2] : memref<8xi32, #tpu.memory_space<smem>>
    %9 = arith.index_cast %8 : i32 to index
    %c0_6 = arith.constant 0 : index
    %10 = vector.load %arg1[%9, %c0_6] : memref<64x128xf32, #tpu.memory_space<vmem>>, vector<1x128xf32>
    %c2_7 = arith.constant 2 : index
    %c0_8 = arith.constant 0 : index
    %11 = vector.load %arg11[%c2_7, %c0_8] : memref<8x128xf32, #tpu.memory_space<vmem>>, vector<1x128xf32>
    tpu.vector_store %arg11[%c2_7, %c0_8], %10 {strides = array<i32>} : memref<8x128xf32, #tpu.memory_space<vmem>>, vector<1x128xf32>,
    %c3 = arith.constant 3 : index
    %12 = memref.load %arg0[%c3] : memref<8xi32, #tpu.memory_space<smem>>
    %13 = arith.index_cast %12 : i32 to index
    %c0_9 = arith.constant 0 : index
    %14 = vector.load %arg1[%13, %c0_9] : memref<64x128xf32, #tpu.memory_space<vmem>>, vector<1x128xf32>
    %c3_10 = arith.constant 3 : index
    %c0_11 = arith.constant 0 : index
    %15 = vector.load %arg11[%c3_10, %c0_11] : memref<8x128xf32, #tpu.memory_space<vmem>>, vector<1x128xf32>
    tpu.vector_store %arg11[%c3_10, %c0_11], %14 {strides = array<i32>} : memref<8x128xf32, #tpu.memory_space<vmem>>, vector<1x128xf32>,
    %c4 = arith.constant 4 : index
    %16 = memref.load %arg0[%c4] : memref<8xi32, #tpu.memory_space<smem>>
    %17 = arith.index_cast %16 : i32 to index
    %c0_12 = arith.constant 0 : index
    %18 = vector.load %arg1[%17, %c0_12] : memref<64x128xf32, #tpu.memory_space<vmem>>, vector<1x128xf32>
    %c4_13 = arith.constant 4 : index
    %c0_14 = arith.constant 0 : index
    %19 = vector.load %arg11[%c4_13, %c0_14] : memref<8x128xf32, #tpu.memory_space<vmem>>, vector<1x128xf32>
    tpu.vector_store %arg11[%c4_13, %c0_14], %18 {strides = array<i32>} : memref<8x128xf32, #tpu.memory_space<vmem>>, vector<1x128xf32>,
    %c5 = arith.constant 5 : index
    %20 = memref.load %arg0[%c5] : memref<8xi32, #tpu.memory_space<smem>>
    %21 = arith.index_cast %20 : i32 to index
    %c0_15 = arith.constant 0 : index
    %22 = vector.load %arg1[%21, %c0_15] : memref<64x128xf32, #tpu.memory_space<vmem>>, vector<1x128xf32>
    %c5_16 = arith.constant 5 : index
    %c0_17 = arith.constant 0 : index
    %23 = vector.load %arg11[%c5_16, %c0_17] : memref<8x128xf32, #tpu.memory_space<vmem>>, vector<1x128xf32>
    tpu.vector_store %arg11[%c5_16, %c0_17], %22 {strides = array<i32>} : memref<8x128xf32, #tpu.memory_space<vmem>>, vector<1x128xf32>,
    %c6 = arith.constant 6 : index
    %24 = memref.load %arg0[%c6] : memref<8xi32, #tpu.memory_space<smem>>
    %25 = arith.index_cast %24 : i32 to index
    %c0_18 = arith.constant 0 : index
    %26 = vector.load %arg1[%25, %c0_18] : memref<64x128xf32, #tpu.memory_space<vmem>>, vector<1x128xf32>
    %c6_19 = arith.constant 6 : index
    %c0_20 = arith.constant 0 : index
    %27 = vector.load %arg11[%c6_19, %c0_20] : memref<8x128xf32, #tpu.memory_space<vmem>>, vector<1x128xf32>
    tpu.vector_store %arg11[%c6_19, %c0_20], %26 {strides = array<i32>} : memref<8x128xf32, #tpu.memory_space<vmem>>, vector<1x128xf32>,
    %c7 = arith.constant 7 : index
    %28 = memref.load %arg0[%c7] : memref<8xi32, #tpu.memory_space<smem>>
    %29 = arith.index_cast %28 : i32 to index
    %c0_21 = arith.constant 0 : index
    %30 = vector.load %arg1[%29, %c0_21] : memref<64x128xf32, #tpu.memory_space<vmem>>, vector<1x128xf32>
    %c7_22 = arith.constant 7 : index
    %c0_23 = arith.constant 0 : index
    %31 = vector.load %arg11[%c7_22, %c0_23] : memref<8x128xf32, #tpu.memory_space<vmem>>, vector<1x128xf32>
    tpu.vector_store %arg11[%c7_22, %c0_23], %30 {strides = array<i32>} : memref<8x128xf32, #tpu.memory_space<vmem>>, vector<1x128xf32>,
    %cst = arith.constant 0.000000e+00 : f32
    %32 = vector.broadcast %cst : f32 to vector<1x32xf32>
    %c0_24 = arith.constant 0 : index
    %c0_25 = arith.constant 0 : index
    %33 = vector.load %arg11[%c0_24, %c0_25] : memref<8x128xf32, #tpu.memory_space<vmem>>, vector<8x128xf32>
    %c0_26 = arith.constant 0 : index
    %c0_27 = arith.constant 0 : index
    %34 = vector.load %arg2[%c0_26, %c0_27] : memref<128x128xf32, #tpu.memory_space<vmem>>, vector<128x128xf32>
    %cst_28 = arith.constant dense<0.000000e+00> : vector<8x128xf32>
    %35 = tpu.matmul %33, %34, %cst_28 {dimension_numbers = #tpu.dot_dimension_numbers<[1], [0], [0], [1], [0, 0, 1, 1], [], []>} : vector<8x128xf32>, vector<128x128xf32>, vector<8x128xf32> -> vector<8x128xf32>
    %c0_29 = arith.constant 0 : index
    %c0_30 = arith.constant 0 : index
    %36 = vector.load %arg4[%c0_29, %c0_30] : memref<1x128xf32, #tpu.memory_space<vmem>>, vector<1x128xf32>
    %37 = vector.broadcast %36 : vector<1x128xf32> to vector<8x128xf32>
    %38 = arith.addf %35, %37 : vector<8x128xf32>
    %c0_31 = arith.constant 0 : index
    %c0_32 = arith.constant 0 : index
    %39 = vector.load %arg3[%c0_31, %c0_32] : memref<32x128xf32, #tpu.memory_space<vmem>>, vector<32x128xf32>
    %40 = vector.extract_strided_slice %38 {offsets = [0, 0], sizes = [1, 128], strides = [1, 1]} : vector<8x128xf32> to vector<1x128xf32>
    %cst_33 = arith.constant dense<0.000000e+00> : vector<1x128xf32>
    %41 = tpu.matmul %32, %39, %cst_33 {dimension_numbers = #tpu.dot_dimension_numbers<[1], [0], [0], [1], [0, 0, 1, 1], [], []>} : vector<1x32xf32>, vector<32x128xf32>, vector<1x128xf32> -> vector<1x128xf32>
    %42 = arith.addf %40, %41 : vector<1x128xf32>
    %43 = arith.negf %42 : vector<1x128xf32>
    %44 = math.exp %43 : vector<1x128xf32>
    %cst_34 = arith.constant 1.000000e+00 : f32
    %45 = vector.broadcast %cst_34 : f32 to vector<1x128xf32>
    %46 = arith.addf %45, %44 : vector<1x128xf32>
    %47 = arith.divf %45, %46 : vector<1x128xf32>
    %48 = math.tanh %42 : vector<1x128xf32>
    %49 = vector.extract_strided_slice %47 {offsets = [0, 0], sizes = [1, 32], strides = [1, 1]} : vector<1x128xf32> to vector<1x32xf32>
    %50 = vector.extract_strided_slice %47 {offsets = [0, 32], sizes = [1, 32], strides = [1, 1]} : vector<1x128xf32> to vector<1x32xf32>
    %51 = vector.extract_strided_slice %48 {offsets = [0, 64], sizes = [1, 32], strides = [1, 1]} : vector<1x128xf32> to vector<1x32xf32>
    %52 = vector.extract_strided_slice %47 {offsets = [0, 96], sizes = [1, 32], strides = [1, 1]} : vector<1x128xf32> to vector<1x32xf32>
    %53 = arith.mulf %50, %32 : vector<1x32xf32>
    %54 = arith.mulf %49, %51 : vector<1x32xf32>
    %55 = arith.addf %53, %54 : vector<1x32xf32>
    %56 = math.tanh %55 : vector<1x32xf32>
    %57 = arith.mulf %52, %56 : vector<1x32xf32>
    %c0_35 = arith.constant 0 : index
    %c0_36 = arith.constant 0 : index
    %58 = vector.load %arg12[%c0_35, %c0_36] : memref<8x32xf32, #tpu.memory_space<vmem>>, vector<1x32xf32>
    tpu.vector_store %arg12[%c0_35, %c0_36], %57 {strides = array<i32>} : memref<8x32xf32, #tpu.memory_space<vmem>>, vector<1x32xf32>,
    %59 = vector.extract_strided_slice %38 {offsets = [1, 0], sizes = [1, 128], strides = [1, 1]} : vector<8x128xf32> to vector<1x128xf32>
    %cst_37 = arith.constant dense<0.000000e+00> : vector<1x128xf32>
    %60 = tpu.matmul %57, %39, %cst_37 {dimension_numbers = #tpu.dot_dimension_numbers<[1], [0], [0], [1], [0, 0, 1, 1], [], []>} : vector<1x32xf32>, vector<32x128xf32>, vector<1x128xf32> -> vector<1x128xf32>
    %61 = arith.addf %59, %60 : vector<1x128xf32>
    %62 = arith.negf %61 : vector<1x128xf32>
    %63 = math.exp %62 : vector<1x128xf32>
    %cst_38 = arith.constant 1.000000e+00 : f32
    %64 = vector.broadcast %cst_38 : f32 to vector<1x128xf32>
    %65 = arith.addf %64, %63 : vector<1x128xf32>
    %66 = arith.divf %64, %65 : vector<1x128xf32>
    %67 = math.tanh %61 : vector<1x128xf32>
    %68 = vector.extract_strided_slice %66 {offsets = [0, 0], sizes = [1, 32], strides = [1, 1]} : vector<1x128xf32> to vector<1x32xf32>
    %69 = vector.extract_strided_slice %66 {offsets = [0, 32], sizes = [1, 32], strides = [1, 1]} : vector<1x128xf32> to vector<1x32xf32>
    %70 = vector.extract_strided_slice %67 {offsets = [0, 64], sizes = [1, 32], strides = [1, 1]} : vector<1x128xf32> to vector<1x32xf32>
    %71 = vector.extract_strided_slice %66 {offsets = [0, 96], sizes = [1, 32], strides = [1, 1]} : vector<1x128xf32> to vector<1x32xf32>
    %72 = arith.mulf %69, %55 : vector<1x32xf32>
    %73 = arith.mulf %68, %70 : vector<1x32xf32>
    %74 = arith.addf %72, %73 : vector<1x32xf32>
    %75 = math.tanh %74 : vector<1x32xf32>
    %76 = arith.mulf %71, %75 : vector<1x32xf32>
    %c1_39 = arith.constant 1 : index
    %c0_40 = arith.constant 0 : index
    %77 = vector.load %arg12[%c1_39, %c0_40] : memref<8x32xf32, #tpu.memory_space<vmem>>, vector<1x32xf32>
    tpu.vector_store %arg12[%c1_39, %c0_40], %76 {strides = array<i32>} : memref<8x32xf32, #tpu.memory_space<vmem>>, vector<1x32xf32>,
    %78 = vector.extract_strided_slice %38 {offsets = [2, 0], sizes = [1, 128], strides = [1, 1]} : vector<8x128xf32> to vector<1x128xf32>
    %cst_41 = arith.constant dense<0.000000e+00> : vector<1x128xf32>
    %79 = tpu.matmul %76, %39, %cst_41 {dimension_numbers = #tpu.dot_dimension_numbers<[1], [0], [0], [1], [0, 0, 1, 1], [], []>} : vector<1x32xf32>, vector<32x128xf32>, vector<1x128xf32> -> vector<1x128xf32>
    %80 = arith.addf %78, %79 : vector<1x128xf32>
    %81 = arith.negf %80 : vector<1x128xf32>
    %82 = math.exp %81 : vector<1x128xf32>
    %cst_42 = arith.constant 1.000000e+00 : f32
    %83 = vector.broadcast %cst_42 : f32 to vector<1x128xf32>
    %84 = arith.addf %83, %82 : vector<1x128xf32>
    %85 = arith.divf %83, %84 : vector<1x128xf32>
    %86 = math.tanh %80 : vector<1x128xf32>
    %87 = vector.extract_strided_slice %85 {offsets = [0, 0], sizes = [1, 32], strides = [1, 1]} : vector<1x128xf32> to vector<1x32xf32>
    %88 = vector.extract_strided_slice %85 {offsets = [0, 32], sizes = [1, 32], strides = [1, 1]} : vector<1x128xf32> to vector<1x32xf32>
    %89 = vector.extract_strided_slice %86 {offsets = [0, 64], sizes = [1, 32], strides = [1, 1]} : vector<1x128xf32> to vector<1x32xf32>
    %90 = vector.extract_strided_slice %85 {offsets = [0, 96], sizes = [1, 32], strides = [1, 1]} : vector<1x128xf32> to vector<1x32xf32>
    %91 = arith.mulf %88, %74 : vector<1x32xf32>
    %92 = arith.mulf %87, %89 : vector<1x32xf32>
    %93 = arith.addf %91, %92 : vector<1x32xf32>
    %94 = math.tanh %93 : vector<1x32xf32>
    %95 = arith.mulf %90, %94 : vector<1x32xf32>
    %c2_43 = arith.constant 2 : index
    %c0_44 = arith.constant 0 : index
    %96 = vector.load %arg12[%c2_43, %c0_44] : memref<8x32xf32, #tpu.memory_space<vmem>>, vector<1x32xf32>
    tpu.vector_store %arg12[%c2_43, %c0_44], %95 {strides = array<i32>} : memref<8x32xf32, #tpu.memory_space<vmem>>, vector<1x32xf32>,
    %97 = vector.extract_strided_slice %38 {offsets = [3, 0], sizes = [1, 128], strides = [1, 1]} : vector<8x128xf32> to vector<1x128xf32>
    %cst_45 = arith.constant dense<0.000000e+00> : vector<1x128xf32>
    %98 = tpu.matmul %95, %39, %cst_45 {dimension_numbers = #tpu.dot_dimension_numbers<[1], [0], [0], [1], [0, 0, 1, 1], [], []>} : vector<1x32xf32>, vector<32x128xf32>, vector<1x128xf32> -> vector<1x128xf32>
    %99 = arith.addf %97, %98 : vector<1x128xf32>
    %100 = arith.negf %99 : vector<1x128xf32>
    %101 = math.exp %100 : vector<1x128xf32>
    %cst_46 = arith.constant 1.000000e+00 : f32
    %102 = vector.broadcast %cst_46 : f32 to vector<1x128xf32>
    %103 = arith.addf %102, %101 : vector<1x128xf32>
    %104 = arith.divf %102, %103 : vector<1x128xf32>
    %105 = math.tanh %99 : vector<1x128xf32>
    %106 = vector.extract_strided_slice %104 {offsets = [0, 0], sizes = [1, 32], strides = [1, 1]} : vector<1x128xf32> to vector<1x32xf32>
    %107 = vector.extract_strided_slice %104 {offsets = [0, 32], sizes = [1, 32], strides = [1, 1]} : vector<1x128xf32> to vector<1x32xf32>
    %108 = vector.extract_strided_slice %105 {offsets = [0, 64], sizes = [1, 32], strides = [1, 1]} : vector<1x128xf32> to vector<1x32xf32>
    %109 = vector.extract_strided_slice %104 {offsets = [0, 96], sizes = [1, 32], strides = [1, 1]} : vector<1x128xf32> to vector<1x32xf32>
    %110 = arith.mulf %107, %93 : vector<1x32xf32>
    %111 = arith.mulf %106, %108 : vector<1x32xf32>
    %112 = arith.addf %110, %111 : vector<1x32xf32>
    %113 = math.tanh %112 : vector<1x32xf32>
    %114 = arith.mulf %109, %113 : vector<1x32xf32>
    %c3_47 = arith.constant 3 : index
    %c0_48 = arith.constant 0 : index
    %115 = vector.load %arg12[%c3_47, %c0_48] : memref<8x32xf32, #tpu.memory_space<vmem>>, vector<1x32xf32>
    tpu.vector_store %arg12[%c3_47, %c0_48], %114 {strides = array<i32>} : memref<8x32xf32, #tpu.memory_space<vmem>>, vector<1x32xf32>,
    %116 = vector.extract_strided_slice %38 {offsets = [4, 0], sizes = [1, 128], strides = [1, 1]} : vector<8x128xf32> to vector<1x128xf32>
    %cst_49 = arith.constant dense<0.000000e+00> : vector<1x128xf32>
    %117 = tpu.matmul %114, %39, %cst_49 {dimension_numbers = #tpu.dot_dimension_numbers<[1], [0], [0], [1], [0, 0, 1, 1], [], []>} : vector<1x32xf32>, vector<32x128xf32>, vector<1x128xf32> -> vector<1x128xf32>
    %118 = arith.addf %116, %117 : vector<1x128xf32>
    %119 = arith.negf %118 : vector<1x128xf32>
    %120 = math.exp %119 : vector<1x128xf32>
    %cst_50 = arith.constant 1.000000e+00 : f32
    %121 = vector.broadcast %cst_50 : f32 to vector<1x128xf32>
    %122 = arith.addf %121, %120 : vector<1x128xf32>
    %123 = arith.divf %121, %122 : vector<1x128xf32>
    %124 = math.tanh %118 : vector<1x128xf32>
    %125 = vector.extract_strided_slice %123 {offsets = [0, 0], sizes = [1, 32], strides = [1, 1]} : vector<1x128xf32> to vector<1x32xf32>
    %126 = vector.extract_strided_slice %123 {offsets = [0, 32], sizes = [1, 32], strides = [1, 1]} : vector<1x128xf32> to vector<1x32xf32>
    %127 = vector.extract_strided_slice %124 {offsets = [0, 64], sizes = [1, 32], strides = [1, 1]} : vector<1x128xf32> to vector<1x32xf32>
    %128 = vector.extract_strided_slice %123 {offsets = [0, 96], sizes = [1, 32], strides = [1, 1]} : vector<1x128xf32> to vector<1x32xf32>
    %129 = arith.mulf %126, %112 : vector<1x32xf32>
    %130 = arith.mulf %125, %127 : vector<1x32xf32>
    %131 = arith.addf %129, %130 : vector<1x32xf32>
    %132 = math.tanh %131 : vector<1x32xf32>
    %133 = arith.mulf %128, %132 : vector<1x32xf32>
    %c4_51 = arith.constant 4 : index
    %c0_52 = arith.constant 0 : index
    %134 = vector.load %arg12[%c4_51, %c0_52] : memref<8x32xf32, #tpu.memory_space<vmem>>, vector<1x32xf32>
    tpu.vector_store %arg12[%c4_51, %c0_52], %133 {strides = array<i32>} : memref<8x32xf32, #tpu.memory_space<vmem>>, vector<1x32xf32>,
    %135 = vector.extract_strided_slice %38 {offsets = [5, 0], sizes = [1, 128], strides = [1, 1]} : vector<8x128xf32> to vector<1x128xf32>
    %cst_53 = arith.constant dense<0.000000e+00> : vector<1x128xf32>
    %136 = tpu.matmul %133, %39, %cst_53 {dimension_numbers = #tpu.dot_dimension_numbers<[1], [0], [0], [1], [0, 0, 1, 1], [], []>} : vector<1x32xf32>, vector<32x128xf32>, vector<1x128xf32> -> vector<1x128xf32>
    %137 = arith.addf %135, %136 : vector<1x128xf32>
    %138 = arith.negf %137 : vector<1x128xf32>
    %139 = math.exp %138 : vector<1x128xf32>
    %cst_54 = arith.constant 1.000000e+00 : f32
    %140 = vector.broadcast %cst_54 : f32 to vector<1x128xf32>
    %141 = arith.addf %140, %139 : vector<1x128xf32>
    %142 = arith.divf %140, %141 : vector<1x128xf32>
    %143 = math.tanh %137 : vector<1x128xf32>
    %144 = vector.extract_strided_slice %142 {offsets = [0, 0], sizes = [1, 32], strides = [1, 1]} : vector<1x128xf32> to vector<1x32xf32>
    %145 = vector.extract_strided_slice %142 {offsets = [0, 32], sizes = [1, 32], strides = [1, 1]} : vector<1x128xf32> to vector<1x32xf32>
    %146 = vector.extract_strided_slice %143 {offsets = [0, 64], sizes = [1, 32], strides = [1, 1]} : vector<1x128xf32> to vector<1x32xf32>
    %147 = vector.extract_strided_slice %142 {offsets = [0, 96], sizes = [1, 32], strides = [1, 1]} : vector<1x128xf32> to vector<1x32xf32>
    %148 = arith.mulf %145, %131 : vector<1x32xf32>
    %149 = arith.mulf %144, %146 : vector<1x32xf32>
    %150 = arith.addf %148, %149 : vector<1x32xf32>
    %151 = math.tanh %150 : vector<1x32xf32>
    %152 = arith.mulf %147, %151 : vector<1x32xf32>
    %c5_55 = arith.constant 5 : index
    %c0_56 = arith.constant 0 : index
    %153 = vector.load %arg12[%c5_55, %c0_56] : memref<8x32xf32, #tpu.memory_space<vmem>>, vector<1x32xf32>
    tpu.vector_store %arg12[%c5_55, %c0_56], %152 {strides = array<i32>} : memref<8x32xf32, #tpu.memory_space<vmem>>, vector<1x32xf32>,
    %154 = vector.extract_strided_slice %38 {offsets = [6, 0], sizes = [1, 128], strides = [1, 1]} : vector<8x128xf32> to vector<1x128xf32>
    %cst_57 = arith.constant dense<0.000000e+00> : vector<1x128xf32>
    %155 = tpu.matmul %152, %39, %cst_57 {dimension_numbers = #tpu.dot_dimension_numbers<[1], [0], [0], [1], [0, 0, 1, 1], [], []>} : vector<1x32xf32>, vector<32x128xf32>, vector<1x128xf32> -> vector<1x128xf32>
    %156 = arith.addf %154, %155 : vector<1x128xf32>
    %157 = arith.negf %156 : vector<1x128xf32>
    %158 = math.exp %157 : vector<1x128xf32>
    %cst_58 = arith.constant 1.000000e+00 : f32
    %159 = vector.broadcast %cst_58 : f32 to vector<1x128xf32>
    %160 = arith.addf %159, %158 : vector<1x128xf32>
    %161 = arith.divf %159, %160 : vector<1x128xf32>
    %162 = math.tanh %156 : vector<1x128xf32>
    %163 = vector.extract_strided_slice %161 {offsets = [0, 0], sizes = [1, 32], strides = [1, 1]} : vector<1x128xf32> to vector<1x32xf32>
    %164 = vector.extract_strided_slice %161 {offsets = [0, 32], sizes = [1, 32], strides = [1, 1]} : vector<1x128xf32> to vector<1x32xf32>
    %165 = vector.extract_strided_slice %162 {offsets = [0, 64], sizes = [1, 32], strides = [1, 1]} : vector<1x128xf32> to vector<1x32xf32>
    %166 = vector.extract_strided_slice %161 {offsets = [0, 96], sizes = [1, 32], strides = [1, 1]} : vector<1x128xf32> to vector<1x32xf32>
    %167 = arith.mulf %164, %150 : vector<1x32xf32>
    %168 = arith.mulf %163, %165 : vector<1x32xf32>
    %169 = arith.addf %167, %168 : vector<1x32xf32>
    %170 = math.tanh %169 : vector<1x32xf32>
    %171 = arith.mulf %166, %170 : vector<1x32xf32>
    %c6_59 = arith.constant 6 : index
    %c0_60 = arith.constant 0 : index
    %172 = vector.load %arg12[%c6_59, %c0_60] : memref<8x32xf32, #tpu.memory_space<vmem>>, vector<1x32xf32>
    tpu.vector_store %arg12[%c6_59, %c0_60], %171 {strides = array<i32>} : memref<8x32xf32, #tpu.memory_space<vmem>>, vector<1x32xf32>,
    %173 = vector.extract_strided_slice %38 {offsets = [7, 0], sizes = [1, 128], strides = [1, 1]} : vector<8x128xf32> to vector<1x128xf32>
    %cst_61 = arith.constant dense<0.000000e+00> : vector<1x128xf32>
    %174 = tpu.matmul %171, %39, %cst_61 {dimension_numbers = #tpu.dot_dimension_numbers<[1], [0], [0], [1], [0, 0, 1, 1], [], []>} : vector<1x32xf32>, vector<32x128xf32>, vector<1x128xf32> -> vector<1x128xf32>
    %175 = arith.addf %173, %174 : vector<1x128xf32>
    %176 = arith.negf %175 : vector<1x128xf32>
    %177 = math.exp %176 : vector<1x128xf32>
    %cst_62 = arith.constant 1.000000e+00 : f32
    %178 = vector.broadcast %cst_62 : f32 to vector<1x128xf32>
    %179 = arith.addf %178, %177 : vector<1x128xf32>
    %180 = arith.divf %178, %179 : vector<1x128xf32>
    %181 = math.tanh %175 : vector<1x128xf32>
    %182 = vector.extract_strided_slice %180 {offsets = [0, 0], sizes = [1, 32], strides = [1, 1]} : vector<1x128xf32> to vector<1x32xf32>
    %183 = vector.extract_strided_slice %180 {offsets = [0, 32], sizes = [1, 32], strides = [1, 1]} : vector<1x128xf32> to vector<1x32xf32>
    %184 = vector.extract_strided_slice %181 {offsets = [0, 64], sizes = [1, 32], strides = [1, 1]} : vector<1x128xf32> to vector<1x32xf32>
    %185 = vector.extract_strided_slice %180 {offsets = [0, 96], sizes = [1, 32], strides = [1, 1]} : vector<1x128xf32> to vector<1x32xf32>
    %186 = arith.mulf %183, %169 : vector<1x32xf32>
    %187 = arith.mulf %182, %184 : vector<1x32xf32>
    %188 = arith.addf %186, %187 : vector<1x32xf32>
    %189 = math.tanh %188 : vector<1x32xf32>
    %190 = arith.mulf %185, %189 : vector<1x32xf32>
    %c7_63 = arith.constant 7 : index
    %c0_64 = arith.constant 0 : index
    %191 = vector.load %arg12[%c7_63, %c0_64] : memref<8x32xf32, #tpu.memory_space<vmem>>, vector<1x32xf32>
    tpu.vector_store %arg12[%c7_63, %c0_64], %190 {strides = array<i32>} : memref<8x32xf32, #tpu.memory_space<vmem>>, vector<1x32xf32>,
    %c0_65 = arith.constant 0 : index
    %c0_66 = arith.constant 0 : index
    %192 = vector.load %arg12[%c0_65, %c0_66] : memref<8x32xf32, #tpu.memory_space<vmem>>, vector<8x32xf32>
    %c0_67 = arith.constant 0 : index
    %c0_68 = arith.constant 0 : index
    %193 = vector.load %arg5[%c0_67, %c0_68] : memref<32x128xf32, #tpu.memory_space<vmem>>, vector<32x128xf32>
    %cst_69 = arith.constant dense<0.000000e+00> : vector<8x128xf32>
    %194 = tpu.matmul %192, %193, %cst_69 {dimension_numbers = #tpu.dot_dimension_numbers<[1], [0], [0], [1], [0, 0, 1, 1], [], []>} : vector<8x32xf32>, vector<32x128xf32>, vector<8x128xf32> -> vector<8x128xf32>
    %c0_70 = arith.constant 0 : index
    %c0_71 = arith.constant 0 : index
    %195 = vector.load %arg7[%c0_70, %c0_71] : memref<1x128xf32, #tpu.memory_space<vmem>>, vector<1x128xf32>
    %196 = vector.broadcast %195 : vector<1x128xf32> to vector<8x128xf32>
    %197 = arith.addf %194, %196 : vector<8x128xf32>
    %c0_72 = arith.constant 0 : index
    %c0_73 = arith.constant 0 : index
    %198 = vector.load %arg6[%c0_72, %c0_73] : memref<32x128xf32, #tpu.memory_space<vmem>>, vector<32x128xf32>
    %199 = vector.extract_strided_slice %197 {offsets = [0, 0], sizes = [1, 128], strides = [1, 1]} : vector<8x128xf32> to vector<1x128xf32>
    %cst_74 = arith.constant dense<0.000000e+00> : vector<1x128xf32>
    %200 = tpu.matmul %32, %198, %cst_74 {dimension_numbers = #tpu.dot_dimension_numbers<[1], [0], [0], [1], [0, 0, 1, 1], [], []>} : vector<1x32xf32>, vector<32x128xf32>, vector<1x128xf32> -> vector<1x128xf32>
    %201 = arith.addf %199, %200 : vector<1x128xf32>
    %202 = arith.negf %201 : vector<1x128xf32>
    %203 = math.exp %202 : vector<1x128xf32>
    %cst_75 = arith.constant 1.000000e+00 : f32
    %204 = vector.broadcast %cst_75 : f32 to vector<1x128xf32>
    %205 = arith.addf %204, %203 : vector<1x128xf32>
    %206 = arith.divf %204, %205 : vector<1x128xf32>
    %207 = math.tanh %201 : vector<1x128xf32>
    %208 = vector.extract_strided_slice %206 {offsets = [0, 0], sizes = [1, 32], strides = [1, 1]} : vector<1x128xf32> to vector<1x32xf32>
    %209 = vector.extract_strided_slice %206 {offsets = [0, 32], sizes = [1, 32], strides = [1, 1]} : vector<1x128xf32> to vector<1x32xf32>
    %210 = vector.extract_strided_slice %207 {offsets = [0, 64], sizes = [1, 32], strides = [1, 1]} : vector<1x128xf32> to vector<1x32xf32>
    %211 = vector.extract_strided_slice %206 {offsets = [0, 96], sizes = [1, 32], strides = [1, 1]} : vector<1x128xf32> to vector<1x32xf32>
    %212 = arith.mulf %209, %32 : vector<1x32xf32>
    %213 = arith.mulf %208, %210 : vector<1x32xf32>
    %214 = arith.addf %212, %213 : vector<1x32xf32>
    %215 = math.tanh %214 : vector<1x32xf32>
    %216 = arith.mulf %211, %215 : vector<1x32xf32>
    %c0_76 = arith.constant 0 : index
    %c0_77 = arith.constant 0 : index
    %217 = vector.load %arg13[%c0_76, %c0_77] : memref<8x32xf32, #tpu.memory_space<vmem>>, vector<1x32xf32>
    tpu.vector_store %arg13[%c0_76, %c0_77], %216 {strides = array<i32>} : memref<8x32xf32, #tpu.memory_space<vmem>>, vector<1x32xf32>,
    %218 = vector.extract_strided_slice %197 {offsets = [1, 0], sizes = [1, 128], strides = [1, 1]} : vector<8x128xf32> to vector<1x128xf32>
    %cst_78 = arith.constant dense<0.000000e+00> : vector<1x128xf32>
    %219 = tpu.matmul %216, %198, %cst_78 {dimension_numbers = #tpu.dot_dimension_numbers<[1], [0], [0], [1], [0, 0, 1, 1], [], []>} : vector<1x32xf32>, vector<32x128xf32>, vector<1x128xf32> -> vector<1x128xf32>
    %220 = arith.addf %218, %219 : vector<1x128xf32>
    %221 = arith.negf %220 : vector<1x128xf32>
    %222 = math.exp %221 : vector<1x128xf32>
    %cst_79 = arith.constant 1.000000e+00 : f32
    %223 = vector.broadcast %cst_79 : f32 to vector<1x128xf32>
    %224 = arith.addf %223, %222 : vector<1x128xf32>
    %225 = arith.divf %223, %224 : vector<1x128xf32>
    %226 = math.tanh %220 : vector<1x128xf32>
    %227 = vector.extract_strided_slice %225 {offsets = [0, 0], sizes = [1, 32], strides = [1, 1]} : vector<1x128xf32> to vector<1x32xf32>
    %228 = vector.extract_strided_slice %225 {offsets = [0, 32], sizes = [1, 32], strides = [1, 1]} : vector<1x128xf32> to vector<1x32xf32>
    %229 = vector.extract_strided_slice %226 {offsets = [0, 64], sizes = [1, 32], strides = [1, 1]} : vector<1x128xf32> to vector<1x32xf32>
    %230 = vector.extract_strided_slice %225 {offsets = [0, 96], sizes = [1, 32], strides = [1, 1]} : vector<1x128xf32> to vector<1x32xf32>
    %231 = arith.mulf %228, %214 : vector<1x32xf32>
    %232 = arith.mulf %227, %229 : vector<1x32xf32>
    %233 = arith.addf %231, %232 : vector<1x32xf32>
    %234 = math.tanh %233 : vector<1x32xf32>
    %235 = arith.mulf %230, %234 : vector<1x32xf32>
    %c1_80 = arith.constant 1 : index
    %c0_81 = arith.constant 0 : index
    %236 = vector.load %arg13[%c1_80, %c0_81] : memref<8x32xf32, #tpu.memory_space<vmem>>, vector<1x32xf32>
    tpu.vector_store %arg13[%c1_80, %c0_81], %235 {strides = array<i32>} : memref<8x32xf32, #tpu.memory_space<vmem>>, vector<1x32xf32>,
    %237 = vector.extract_strided_slice %197 {offsets = [2, 0], sizes = [1, 128], strides = [1, 1]} : vector<8x128xf32> to vector<1x128xf32>
    %cst_82 = arith.constant dense<0.000000e+00> : vector<1x128xf32>
    %238 = tpu.matmul %235, %198, %cst_82 {dimension_numbers = #tpu.dot_dimension_numbers<[1], [0], [0], [1], [0, 0, 1, 1], [], []>} : vector<1x32xf32>, vector<32x128xf32>, vector<1x128xf32> -> vector<1x128xf32>
    %239 = arith.addf %237, %238 : vector<1x128xf32>
    %240 = arith.negf %239 : vector<1x128xf32>
    %241 = math.exp %240 : vector<1x128xf32>
    %cst_83 = arith.constant 1.000000e+00 : f32
    %242 = vector.broadcast %cst_83 : f32 to vector<1x128xf32>
    %243 = arith.addf %242, %241 : vector<1x128xf32>
    %244 = arith.divf %242, %243 : vector<1x128xf32>
    %245 = math.tanh %239 : vector<1x128xf32>
    %246 = vector.extract_strided_slice %244 {offsets = [0, 0], sizes = [1, 32], strides = [1, 1]} : vector<1x128xf32> to vector<1x32xf32>
    %247 = vector.extract_strided_slice %244 {offsets = [0, 32], sizes = [1, 32], strides = [1, 1]} : vector<1x128xf32> to vector<1x32xf32>
    %248 = vector.extract_strided_slice %245 {offsets = [0, 64], sizes = [1, 32], strides = [1, 1]} : vector<1x128xf32> to vector<1x32xf32>
    %249 = vector.extract_strided_slice %244 {offsets = [0, 96], sizes = [1, 32], strides = [1, 1]} : vector<1x128xf32> to vector<1x32xf32>
    %250 = arith.mulf %247, %233 : vector<1x32xf32>
    %251 = arith.mulf %246, %248 : vector<1x32xf32>
    %252 = arith.addf %250, %251 : vector<1x32xf32>
    %253 = math.tanh %252 : vector<1x32xf32>
    %254 = arith.mulf %249, %253 : vector<1x32xf32>
    %c2_84 = arith.constant 2 : index
    %c0_85 = arith.constant 0 : index
    %255 = vector.load %arg13[%c2_84, %c0_85] : memref<8x32xf32, #tpu.memory_space<vmem>>, vector<1x32xf32>
    tpu.vector_store %arg13[%c2_84, %c0_85], %254 {strides = array<i32>} : memref<8x32xf32, #tpu.memory_space<vmem>>, vector<1x32xf32>,
    %256 = vector.extract_strided_slice %197 {offsets = [3, 0], sizes = [1, 128], strides = [1, 1]} : vector<8x128xf32> to vector<1x128xf32>
    %cst_86 = arith.constant dense<0.000000e+00> : vector<1x128xf32>
    %257 = tpu.matmul %254, %198, %cst_86 {dimension_numbers = #tpu.dot_dimension_numbers<[1], [0], [0], [1], [0, 0, 1, 1], [], []>} : vector<1x32xf32>, vector<32x128xf32>, vector<1x128xf32> -> vector<1x128xf32>
    %258 = arith.addf %256, %257 : vector<1x128xf32>
    %259 = arith.negf %258 : vector<1x128xf32>
    %260 = math.exp %259 : vector<1x128xf32>
    %cst_87 = arith.constant 1.000000e+00 : f32
    %261 = vector.broadcast %cst_87 : f32 to vector<1x128xf32>
    %262 = arith.addf %261, %260 : vector<1x128xf32>
    %263 = arith.divf %261, %262 : vector<1x128xf32>
    %264 = math.tanh %258 : vector<1x128xf32>
    %265 = vector.extract_strided_slice %263 {offsets = [0, 0], sizes = [1, 32], strides = [1, 1]} : vector<1x128xf32> to vector<1x32xf32>
    %266 = vector.extract_strided_slice %263 {offsets = [0, 32], sizes = [1, 32], strides = [1, 1]} : vector<1x128xf32> to vector<1x32xf32>
    %267 = vector.extract_strided_slice %264 {offsets = [0, 64], sizes = [1, 32], strides = [1, 1]} : vector<1x128xf32> to vector<1x32xf32>
    %268 = vector.extract_strided_slice %263 {offsets = [0, 96], sizes = [1, 32], strides = [1, 1]} : vector<1x128xf32> to vector<1x32xf32>
    %269 = arith.mulf %266, %252 : vector<1x32xf32>
    %270 = arith.mulf %265, %267 : vector<1x32xf32>
    %271 = arith.addf %269, %270 : vector<1x32xf32>
    %272 = math.tanh %271 : vector<1x32xf32>
    %273 = arith.mulf %268, %272 : vector<1x32xf32>
    %c3_88 = arith.constant 3 : index
    %c0_89 = arith.constant 0 : index
    %274 = vector.load %arg13[%c3_88, %c0_89] : memref<8x32xf32, #tpu.memory_space<vmem>>, vector<1x32xf32>
    tpu.vector_store %arg13[%c3_88, %c0_89], %273 {strides = array<i32>} : memref<8x32xf32, #tpu.memory_space<vmem>>, vector<1x32xf32>,
    %275 = vector.extract_strided_slice %197 {offsets = [4, 0], sizes = [1, 128], strides = [1, 1]} : vector<8x128xf32> to vector<1x128xf32>
    %cst_90 = arith.constant dense<0.000000e+00> : vector<1x128xf32>
    %276 = tpu.matmul %273, %198, %cst_90 {dimension_numbers = #tpu.dot_dimension_numbers<[1], [0], [0], [1], [0, 0, 1, 1], [], []>} : vector<1x32xf32>, vector<32x128xf32>, vector<1x128xf32> -> vector<1x128xf32>
    %277 = arith.addf %275, %276 : vector<1x128xf32>
    %278 = arith.negf %277 : vector<1x128xf32>
    %279 = math.exp %278 : vector<1x128xf32>
    %cst_91 = arith.constant 1.000000e+00 : f32
    %280 = vector.broadcast %cst_91 : f32 to vector<1x128xf32>
    %281 = arith.addf %280, %279 : vector<1x128xf32>
    %282 = arith.divf %280, %281 : vector<1x128xf32>
    %283 = math.tanh %277 : vector<1x128xf32>
    %284 = vector.extract_strided_slice %282 {offsets = [0, 0], sizes = [1, 32], strides = [1, 1]} : vector<1x128xf32> to vector<1x32xf32>
    %285 = vector.extract_strided_slice %282 {offsets = [0, 32], sizes = [1, 32], strides = [1, 1]} : vector<1x128xf32> to vector<1x32xf32>
    %286 = vector.extract_strided_slice %283 {offsets = [0, 64], sizes = [1, 32], strides = [1, 1]} : vector<1x128xf32> to vector<1x32xf32>
    %287 = vector.extract_strided_slice %282 {offsets = [0, 96], sizes = [1, 32], strides = [1, 1]} : vector<1x128xf32> to vector<1x32xf32>
    %288 = arith.mulf %285, %271 : vector<1x32xf32>
    %289 = arith.mulf %284, %286 : vector<1x32xf32>
    %290 = arith.addf %288, %289 : vector<1x32xf32>
    %291 = math.tanh %290 : vector<1x32xf32>
    %292 = arith.mulf %287, %291 : vector<1x32xf32>
    %c4_92 = arith.constant 4 : index
    %c0_93 = arith.constant 0 : index
    %293 = vector.load %arg13[%c4_92, %c0_93] : memref<8x32xf32, #tpu.memory_space<vmem>>, vector<1x32xf32>
    tpu.vector_store %arg13[%c4_92, %c0_93], %292 {strides = array<i32>} : memref<8x32xf32, #tpu.memory_space<vmem>>, vector<1x32xf32>,
    %294 = vector.extract_strided_slice %197 {offsets = [5, 0], sizes = [1, 128], strides = [1, 1]} : vector<8x128xf32> to vector<1x128xf32>
    %cst_94 = arith.constant dense<0.000000e+00> : vector<1x128xf32>
    %295 = tpu.matmul %292, %198, %cst_94 {dimension_numbers = #tpu.dot_dimension_numbers<[1], [0], [0], [1], [0, 0, 1, 1], [], []>} : vector<1x32xf32>, vector<32x128xf32>, vector<1x128xf32> -> vector<1x128xf32>
    %296 = arith.addf %294, %295 : vector<1x128xf32>
    %297 = arith.negf %296 : vector<1x128xf32>
    %298 = math.exp %297 : vector<1x128xf32>
    %cst_95 = arith.constant 1.000000e+00 : f32
    %299 = vector.broadcast %cst_95 : f32 to vector<1x128xf32>
    %300 = arith.addf %299, %298 : vector<1x128xf32>
    %301 = arith.divf %299, %300 : vector<1x128xf32>
    %302 = math.tanh %296 : vector<1x128xf32>
    %303 = vector.extract_strided_slice %301 {offsets = [0, 0], sizes = [1, 32], strides = [1, 1]} : vector<1x128xf32> to vector<1x32xf32>
    %304 = vector.extract_strided_slice %301 {offsets = [0, 32], sizes = [1, 32], strides = [1, 1]} : vector<1x128xf32> to vector<1x32xf32>
    %305 = vector.extract_strided_slice %302 {offsets = [0, 64], sizes = [1, 32], strides = [1, 1]} : vector<1x128xf32> to vector<1x32xf32>
    %306 = vector.extract_strided_slice %301 {offsets = [0, 96], sizes = [1, 32], strides = [1, 1]} : vector<1x128xf32> to vector<1x32xf32>
    %307 = arith.mulf %304, %290 : vector<1x32xf32>
    %308 = arith.mulf %303, %305 : vector<1x32xf32>
    %309 = arith.addf %307, %308 : vector<1x32xf32>
    %310 = math.tanh %309 : vector<1x32xf32>
    %311 = arith.mulf %306, %310 : vector<1x32xf32>
    %c5_96 = arith.constant 5 : index
    %c0_97 = arith.constant 0 : index
    %312 = vector.load %arg13[%c5_96, %c0_97] : memref<8x32xf32, #tpu.memory_space<vmem>>, vector<1x32xf32>
    tpu.vector_store %arg13[%c5_96, %c0_97], %311 {strides = array<i32>} : memref<8x32xf32, #tpu.memory_space<vmem>>, vector<1x32xf32>,
    %313 = vector.extract_strided_slice %197 {offsets = [6, 0], sizes = [1, 128], strides = [1, 1]} : vector<8x128xf32> to vector<1x128xf32>
    %cst_98 = arith.constant dense<0.000000e+00> : vector<1x128xf32>
    %314 = tpu.matmul %311, %198, %cst_98 {dimension_numbers = #tpu.dot_dimension_numbers<[1], [0], [0], [1], [0, 0, 1, 1], [], []>} : vector<1x32xf32>, vector<32x128xf32>, vector<1x128xf32> -> vector<1x128xf32>
    %315 = arith.addf %313, %314 : vector<1x128xf32>
    %316 = arith.negf %315 : vector<1x128xf32>
    %317 = math.exp %316 : vector<1x128xf32>
    %cst_99 = arith.constant 1.000000e+00 : f32
    %318 = vector.broadcast %cst_99 : f32 to vector<1x128xf32>
    %319 = arith.addf %318, %317 : vector<1x128xf32>
    %320 = arith.divf %318, %319 : vector<1x128xf32>
    %321 = math.tanh %315 : vector<1x128xf32>
    %322 = vector.extract_strided_slice %320 {offsets = [0, 0], sizes = [1, 32], strides = [1, 1]} : vector<1x128xf32> to vector<1x32xf32>
    %323 = vector.extract_strided_slice %320 {offsets = [0, 32], sizes = [1, 32], strides = [1, 1]} : vector<1x128xf32> to vector<1x32xf32>
    %324 = vector.extract_strided_slice %321 {offsets = [0, 64], sizes = [1, 32], strides = [1, 1]} : vector<1x128xf32> to vector<1x32xf32>
    %325 = vector.extract_strided_slice %320 {offsets = [0, 96], sizes = [1, 32], strides = [1, 1]} : vector<1x128xf32> to vector<1x32xf32>
    %326 = arith.mulf %323, %309 : vector<1x32xf32>
    %327 = arith.mulf %322, %324 : vector<1x32xf32>
    %328 = arith.addf %326, %327 : vector<1x32xf32>
    %329 = math.tanh %328 : vector<1x32xf32>
    %330 = arith.mulf %325, %329 : vector<1x32xf32>
    %c6_100 = arith.constant 6 : index
    %c0_101 = arith.constant 0 : index
    %331 = vector.load %arg13[%c6_100, %c0_101] : memref<8x32xf32, #tpu.memory_space<vmem>>, vector<1x32xf32>
    tpu.vector_store %arg13[%c6_100, %c0_101], %330 {strides = array<i32>} : memref<8x32xf32, #tpu.memory_space<vmem>>, vector<1x32xf32>,
    %332 = vector.extract_strided_slice %197 {offsets = [7, 0], sizes = [1, 128], strides = [1, 1]} : vector<8x128xf32> to vector<1x128xf32>
    %cst_102 = arith.constant dense<0.000000e+00> : vector<1x128xf32>
    %333 = tpu.matmul %330, %198, %cst_102 {dimension_numbers = #tpu.dot_dimension_numbers<[1], [0], [0], [1], [0, 0, 1, 1], [], []>} : vector<1x32xf32>, vector<32x128xf32>, vector<1x128xf32> -> vector<1x128xf32>
    %334 = arith.addf %332, %333 : vector<1x128xf32>
    %335 = arith.negf %334 : vector<1x128xf32>
    %336 = math.exp %335 : vector<1x128xf32>
    %cst_103 = arith.constant 1.000000e+00 : f32
    %337 = vector.broadcast %cst_103 : f32 to vector<1x128xf32>
    %338 = arith.addf %337, %336 : vector<1x128xf32>
    %339 = arith.divf %337, %338 : vector<1x128xf32>
    %340 = math.tanh %334 : vector<1x128xf32>
    %341 = vector.extract_strided_slice %339 {offsets = [0, 0], sizes = [1, 32], strides = [1, 1]} : vector<1x128xf32> to vector<1x32xf32>
    %342 = vector.extract_strided_slice %339 {offsets = [0, 32], sizes = [1, 32], strides = [1, 1]} : vector<1x128xf32> to vector<1x32xf32>
    %343 = vector.extract_strided_slice %340 {offsets = [0, 64], sizes = [1, 32], strides = [1, 1]} : vector<1x128xf32> to vector<1x32xf32>
    %344 = vector.extract_strided_slice %339 {offsets = [0, 96], sizes = [1, 32], strides = [1, 1]} : vector<1x128xf32> to vector<1x32xf32>
    %345 = arith.mulf %342, %328 : vector<1x32xf32>
    %346 = arith.mulf %341, %343 : vector<1x32xf32>
    %347 = arith.addf %345, %346 : vector<1x32xf32>
    %348 = math.tanh %347 : vector<1x32xf32>
    %349 = arith.mulf %344, %348 : vector<1x32xf32>
    %c7_104 = arith.constant 7 : index
    %c0_105 = arith.constant 0 : index
    %350 = vector.load %arg13[%c7_104, %c0_105] : memref<8x32xf32, #tpu.memory_space<vmem>>, vector<1x32xf32>
    tpu.vector_store %arg13[%c7_104, %c0_105], %349 {strides = array<i32>} : memref<8x32xf32, #tpu.memory_space<vmem>>, vector<1x32xf32>,
    %c0_106 = arith.constant 0 : index
    %c0_107 = arith.constant 0 : index
    %351 = vector.load %arg13[%c0_106, %c0_107] : memref<8x32xf32, #tpu.memory_space<vmem>>, vector<8x32xf32>
    %c0_108 = arith.constant 0 : index
    %c0_109 = arith.constant 0 : index
    %352 = vector.load %arg8[%c0_108, %c0_109] : memref<32x128xf32, #tpu.memory_space<vmem>>, vector<32x128xf32>
    %cst_110 = arith.constant dense<0.000000e+00> : vector<8x128xf32>
    %353 = tpu.matmul %351, %352, %cst_110 {dimension_numbers = #tpu.dot_dimension_numbers<[1], [0], [0], [1], [0, 0, 1, 1], [], []>} : vector<8x32xf32>, vector<32x128xf32>, vector<8x128xf32> -> vector<8x128xf32>
    %c0_111 = arith.constant 0 : index
    %c0_112 = arith.constant 0 : index
    %354 = vector.load %arg9[%c0_111, %c0_112] : memref<1x128xf32, #tpu.memory_space<vmem>>, vector<1x128xf32>
    %355 = vector.broadcast %354 : vector<1x128xf32> to vector<8x128xf32>
    %356 = arith.addf %353, %355 : vector<8x128xf32>
    %cst_113 = arith.constant 0.000000e+00 : f32
    %357 = vector.broadcast %cst_113 : f32 to vector<8x128xf32>
    %358 = arith.maximumf %356, %357 : vector<8x128xf32>
    %359 = tpu.iota {dimensions = array<i32: 1>} : vector<8x128xi32>
    %c64_i32 = arith.constant 64 : i32
    %360 = vector.broadcast %c64_i32 : i32 to vector<8x128xi32>
    %361 = arith.cmpi slt, %359, %360 : vector<8x128xi32>
    %cst_114 = arith.constant -1.000000e+30 : f32
    %362 = vector.broadcast %cst_114 : f32 to vector<8x128xf32>
    %363 = arith.select %361, %358, %362 : vector<8x128xi1>, vector<8x128xf32>
    %cst_115 = arith.constant dense<0xFF800000> : vector<8xf32>
    %364 = vector.multi_reduction <maximumf>, %363, %cst_115 [1] : vector<8x128xf32> to vector<8xf32>
    %365 = vector.shape_cast %364 : vector<8xf32> to vector<8x1xf32>
    %366 = vector.broadcast %365 : vector<8x1xf32> to vector<8x128xf32>
    %367 = arith.subf %363, %366 : vector<8x128xf32>
    %368 = math.exp %367 : vector<8x128xf32>
    %cst_116 = arith.constant dense<0.000000e+00> : vector<8xf32>
    %369 = vector.multi_reduction <add>, %368, %cst_116 [1] : vector<8x128xf32> to vector<8xf32>
    %370 = vector.shape_cast %369 : vector<8xf32> to vector<8x1xf32>
    %371 = math.log %370 : vector<8x1xf32>
    %372 = vector.broadcast %371 : vector<8x1xf32> to vector<8x128xf32>
    %373 = arith.subf %367, %372 : vector<8x128xf32>
    %c0_117 = arith.constant 0 : index
    %c0_118 = arith.constant 0 : index
    %374 = vector.load %arg10[%c0_117, %c0_118] : memref<8x128xf32, #tpu.memory_space<vmem>>, vector<8x128xf32>
    tpu.vector_store %arg10[%c0_117, %c0_118], %373 {strides = array<i32>} : memref<8x128xf32, #tpu.memory_space<vmem>>, vector<8x128xf32>,
    return
  }
}

</mosaic_0001>

<bundles_post_ra>
// kernel: tpu_custom_call.1
= control target key start
LH: loop header
LB: loop body
LE: loop exit
PB: predicated region body
PF: predicated region fallthrough
CT: control target
= control target key end

     0   :  { %15 = vsyncpa [#allocation8], 0  ;;  %s3436_s0 = inlined_call_operand.hbm [shape: s32[8], index: 0, kind: input, shape index: {}]   ;;  %s3437_s1 = inlined_call_operand.hbm [shape: f32[64,128], index: 1, kind: input, shape index: {}]   ;;  %s3438_s2 = inlined_call_operand.hbm [shape: f32[128,128], index: 2, kind: input, shape index: {}]   ;;  %s3439_s3 = inlined_call_operand.hbm [shape: f32[32,128], index: 3, kind: input, shape index: {}]   ;;  %s3440_s4 = inlined_call_operand.vmem [shape: f32[1,128], index: 4, kind: input, shape index: {}]   ;;  %s3441_s5 = inlined_call_operand.hbm [shape: f32[32,128], index: 5, kind: input, shape index: {}]   ;;  %s3442_s6 = inlined_call_operand.hbm [shape: f32[32,128], index: 6, kind: input, shape index: {}]   ;;  %s3443_s7 = inlined_call_operand.vmem [shape: f32[1,128], index: 7, kind: input, shape index: {}]   ;;  %s3444_s8 = inlined_call_operand.hbm [shape: f32[32,128], index: 8, kind: input, shape index: {}]   ;;  %s3445_s9 = inlined_call_operand.vmem [shape: f32[1,128], index: 9, kind: input, shape index: {}]   ;;  %s3446_s10 = inlined_call_operand.hbm [shape: f32[8,128], index: 10, kind: output, shape index: {}]  }
   0x1   :  { %16 = vsyncpa [#allocation6], 0 }
   0x2   :  { %17 = vsyncpa [#allocation11], 0 }
   0x3   :  { %18 = vsyncpa [#allocation14], 0 }
   0x4   :  { %19 = vsyncpa [#allocation17], 0 }
   0x5   :  { %20 = vsyncpa [#allocation7], 0  ;;  %s2924_s13 = smov [#allocation10]   ;;  %s2925_s15 = smov [#allocation13]  }
   0x6   :  { %s46_s14 = sshll.u32 %s2924_s13, 4  ;;  %s72_s16 = sshll.u32 %s2925_s15, 4  ;;  %s47_s14 = int_to_ptr.vmem [resolvable:$true] %s46_s14  ;;  %s73_s16 = int_to_ptr.vmem [resolvable:$true] %s72_s16 }
   0x7   :  { %s2772_s17 = scalar_lea.vmem %s47_s14, 2048  ;;  %p2777_p1 = scmp.lt.s32.totalorder %s47_s14, %s47_s14 }
   0x8   :  { %p2773_p0 = scmp.ne.s32.totalorder %s47_s14, %s2772_s17  ;;  %p2778_p2 = scmp.lt.s32.totalorder %s2772_s17, %s2772_s17 }
   0xa   :  { %p2779_p3 = por %p2778_p2, %p2777_p1 }
   0xc   :  { %p2780_p4 = pnand %p2779_p3, %p2773_p0 }
   0xe   :  { %2783 = shalt.err (!%p2780_p4)
}
   0xf   :  { %s2926_s18 = smov 128   ;;  %s2927_s19 = smov 8  }
  0x10   :  { %52 = dma.hbm_to_vmem [thread:$0]  %s3438_s2, 2048, %s47_s14, [#allocation11], %s2926_s18, %s2926_s18, %s2927_s19  }
  0x11   :  { %s2792_s22 = scalar_lea.vmem %s73_s16, 512  ;;  %p2797_p6 = scmp.lt.s32.totalorder %s73_s16, %s73_s16 }
  0x12   :  { %p2793_p5 = scmp.ne.s32.totalorder %s73_s16, %s2792_s22  ;;  %p2798_p7 = scmp.lt.s32.totalorder %s2792_s22, %s2792_s22 }
  0x14   :  { %p2799_p8 = por %p2798_p7, %p2797_p6 }
  0x16   :  { %p2800_p9 = pnand %p2799_p8, %p2793_p5 }
  0x18   :  { %2803 = shalt.err (!%p2800_p9)
}
  0x19   :  { %78 = dma.hbm_to_vmem [thread:$0]  %s3441_s5, 512, %s73_s16, [#allocation14], %s2926_s18, %s2926_s18, %s2927_s19  }
  0x1a   :  { %s2928_s25 = smov [#allocation5]   ;;  %s2929_s2 = smov [#allocation9]  }
  0x1b   :  { %28 = dma.hbm_to_smem %s3436_s0, 16, %s2928_s25, [#allocation8]  }
  0x1c   :  { %s34_s28 = sshll.u32 %s2929_s2, 4  ;;  %s2930_s29 = smov [#allocation12]   ;;  %s35_s28 = int_to_ptr.vmem [resolvable:$true] %s34_s28 }
  0x1d   :  { %s58_s30 = sshll.u32 %s2930_s29, 4  ;;  %s2820_s11 = scalar_lea.vmem %s35_s28, 1024  ;;  %s59_s30 = int_to_ptr.vmem [resolvable:$true] %s58_s30 }
  0x1e   :  { %p2821_p10 = scmp.ne.s32.totalorder %s35_s28, %s2820_s11  ;;  %p2825_p11 = scmp.lt.s32.totalorder %s35_s28, %s35_s28 }
  0x1f   :  { %p2826_p12 = scmp.lt.s32.totalorder %s2820_s11, %s2820_s11 }
  0x21   :  { %p2827_p13 = por %p2826_p12, %p2825_p11 }
  0x23   :  { %p2828_p0 = pnand %p2827_p13, %p2821_p10 }
  0x25   :  { %2831 = shalt.err (!%p2828_p0)
}
  0x26   :  { %40 = dma.hbm_to_vmem [thread:$0]  %s3437_s1, 1024, %s35_s28, [#allocation6], %s2926_s18, %s2926_s18, %s2927_s19  }
  0x27   :  { %s2840_s0 = scalar_lea.vmem %s59_s30, 512  ;;  %p2845_p2 = scmp.lt.s32.totalorder %s59_s30, %s59_s30 }
  0x28   :  { %p2841_p1 = scmp.ne.s32.totalorder %s59_s30, %s2840_s0  ;;  %p2846_p3 = scmp.lt.s32.totalorder %s2840_s0, %s2840_s0 }
  0x2a   :  { %p2847_p4 = por %p2846_p3, %p2845_p2 }
  0x2c   :  { %p2848_p5 = pnand %p2847_p4, %p2841_p1 }
  0x2e   :  { %2851 = shalt.err (!%p2848_p5)
}
  0x2f   :  { %64 = dma.hbm_to_vmem [thread:$0]  %s3439_s3, 512, %s59_s30, [#allocation11], %s2926_s18, %s2926_s18, %s2927_s19  }
  0x30   :  { %s2931_s15 = smov [#allocation15]   ;;  %s2932_s17 = smov [#allocation16]  }
  0x31   :  { %s84_s16 = sshll.u32 %s2931_s15, 4  ;;  %s98_s1 = sshll.u32 %s2932_s17, 4  ;;  %s85_s16 = int_to_ptr.vmem [resolvable:$true] %s84_s16  ;;  %s99_s1 = int_to_ptr.vmem [resolvable:$true] %s98_s1 }
  0x32   :  { %s2860_s20 = scalar_lea.vmem %s85_s16, 512  ;;  %p2865_p7 = scmp.lt.s32.totalorder %s85_s16, %s85_s16 }
  0x33   :  { %p2861_p6 = scmp.ne.s32.totalorder %s85_s16, %s2860_s20  ;;  %p2866_p8 = scmp.lt.s32.totalorder %s2860_s20, %s2860_s20 }
  0x35   :  { %p2867_p9 = por %p2866_p8, %p2865_p7 }
  0x37   :  { %p2868_p10 = pnand %p2867_p9, %p2861_p6 }
  0x39   :  { %2871 = shalt.err (!%p2868_p10)
}
  0x3a   :  { %90 = dma.hbm_to_vmem [thread:$0]  %s3442_s6, 512, %s85_s16, [#allocation14], %s2926_s18, %s2926_s18, %s2927_s19  }
  0x3b   :  { %s2880_s3 = scalar_lea.vmem %s99_s1, 512  ;;  %p2885_p12 = scmp.lt.s32.totalorder %s99_s1, %s99_s1 }
  0x3c   :  { %p2881_p11 = scmp.ne.s32.totalorder %s99_s1, %s2880_s3  ;;  %p2886_p13 = scmp.lt.s32.totalorder %s2880_s3, %s2880_s3 }
  0x3e   :  { %p2887_p0 = por %p2886_p13, %p2885_p12 }
  0x40   :  { %p2888_p1 = pnand %p2887_p0, %p2881_p11 }
  0x42   :  { %2891 = shalt.err (!%p2888_p1)
}
  0x43   :  { %104 = dma.hbm_to_vmem [thread:$0]  %s3444_s8, 512, %s99_s1, [#allocation17], %s2926_s18, %s2926_s18, %s2927_s19  }
  0x44   :  { %2912 = dma.done.wait [#allocation8], 16  }
  0x45   :  { %2913 = vsyncadd [#allocation8], 4294967280 }
  0x46   :  { %2914 = dma.done.wait [#allocation6], 1024  }
  0x47   :  { %2915 = vsyncadd [#allocation6], 4294966272 }
  0x48   :  { %2916 = dma.done.wait [#allocation11], 2560  }
  0x49   :  { %2917 = vsyncadd [#allocation11], 4294964736 }
  0x4a   :  { %2918 = dma.done.wait [#allocation14], 1024  }
  0x4b   :  { %2919 = vsyncadd [#allocation14], 4294966272 }
  0x4c   :  { %2920 = dma.done.wait [#allocation17], 512  }
  0x4d   :  { %2921 = vsyncadd [#allocation17], 4294966784 }
  0x4e   :  { %128 = sfence }
  0x4f   :  { %v177_v0 = vld [vmem:[#allocation10 + $0x78] sm:$0xff]  ;;  %v2933_v1 = vmov 0.0   ;;  %v176_v2 = vld [vmem:[#allocation10 + $0x70] sm:$0xff]  ;;  %s3034_s6 = sld [smem:[#allocation5]]  ;;  %vm2934_vm0 = vmmov 0   ;;  %v175_v3 = vld [vmem:[#allocation10 + $0x68] sm:$0xff] }
  0x50   :  { %2385 = vmatprep.subr.mxu0 %v2933_v1  ;;  %2420 = vmatprep.subr.mxu1 %v2933_v1  ;;  %s3038_s8 = sld [smem:[#allocation5 + $0x1]]  ;;  %v3045_v4 = vld [vmem:[#allocation12 + $0x18] sm:$0xff]  ;;  %v174_v5 = vld [vmem:[#allocation10 + $0x60] sm:$0xff]  ;;  %v3051_v6 = vld [vmem:[#allocation12 + $0x10] sm:$0xff]  ;;  %s2935_s16 = smov 64   ;;  %vm362_vm1 = vcmask 253952  }
  0x51   :  { %2386 = vmatpush3.msra.mxu0 %v177_v0  ;;  %2417 = vmatprep.mubr.msk.f32.mxu0 %vm2934_vm0, %v2933_v1  ;;  %s3043_s18 = sld [smem:[#allocation5 + $0x2]]  ;;  %v3056_v7 = vld [vmem:[#allocation12 + $0x8] sm:$0xff]  ;;  %v173_v8 = vld [vmem:[#allocation10 + $0x58] sm:$0xff]  ;;  %v3065_v9 = vld [vmem:[#allocation12] sm:$0xff]  ;;  %vm259_vm2 = vcmask 261120   ;;  %vm471_vm3 = vcmask 254977  }
  0x52   :  { %2387 = vmatprep.subr.mxu0 %v2933_v1  ;;  %2428 = vmatprep.mubr.msk.f32.mxu1 %vm2934_vm0, %v2933_v1  ;;  %s3047_s19 = sld [smem:[#allocation5 + $0x3]]  ;;  %v172_v11 = vld [vmem:[#allocation10 + $0x50] sm:$0xff]  ;;  %v171_v14 = vld [vmem:[#allocation10 + $0x48] sm:$0xff]  ;;  %v170_v17 = vld [vmem:[#allocation10 + $0x40] sm:$0xff]  ;;  %vm695_vm4 = vcmask 257027   ;;  %vm919_vm5 = vcmask 259077  }
  0x53   :  { %2388 = vmatpush3.msra.mxu0 %v176_v2  ;;  %2421 = vmatpush3.msra.mxu1 %v3045_v4  ;;  %s3053_s25 = sld [smem:[#allocation5 + $0x4]]  ;;  %v169_v20 = vld [vmem:[#allocation10 + $0x38] sm:$0xff]  ;;  %v168_v22 = vld [vmem:[#allocation10 + $0x30] sm:$0xff]  ;;  %v167_v23 = vld [vmem:[#allocation10 + $0x28] sm:$0xff]  ;;  %vm583_vm6 = vcmask 256002   ;;  %vm807_vm7 = vcmask 258052  }
  0x54   :  { %2389 = vmatprep.subr.mxu0 %v2933_v1  ;;  %2422 = vmatprep.subr.mxu1 %v2933_v1  ;;  %s3058_s26 = sld [smem:[#allocation5 + $0x5]]  ;;  %v166_v24 = vld [vmem:[#allocation10 + $0x20] sm:$0xff]  ;;  %v165_v25 = vld [vmem:[#allocation10 + $0x18] sm:$0xff]  ;;  %v164_v26 = vld [vmem:[#allocation10 + $0x10] sm:$0xff]  ;;  %vm1031_vm8 = vcmask 260102   ;;  %vm1143_vm9 = vcmask 261127  }
  0x55   :  { %2390 = vmatpush3.msra.mxu0 %v175_v3  ;;  %2423 = vmatpush3.msra.mxu1 %v3051_v6  ;;  %s3062_s27 = sld [smem:[#allocation5 + $0x6]]  ;;  %s130_s2 = scalar_lea.vmem [#allocation9], %s3034_s6  ;;  %v163_v27 = vld [vmem:[#allocation10 + $0x8] sm:$0xff]  ;;  %v162_v28 = vld [vmem:[#allocation10] sm:$0xff] }
  0x56   :  { %2391 = vmatprep.subr.mxu0 %v2933_v1  ;;  %2424 = vmatprep.subr.mxu1 %v2933_v1  ;;  %v131_v10 = vld [vmem:[%s130_s2] sm:$0x1]  ;;  %s3068_s28 = sld [smem:[#allocation5 + $0x7]]  ;;  %s134_s29 = scalar_lea.vmem [#allocation9], %s3038_s8 }
  0x57   :  { %2392 = vmatpush3.msra.mxu0 %v174_v5  ;;  %2425 = vmatpush3.msra.mxu1 %v3056_v7  ;;  %132 = vst [vmem:[#allocation2] sm:$0x1] %v131_v10  ;;  %v135_v12 = vld [vmem:[%s134_s29] sm:$0x1]  ;;  %s138_s30 = scalar_lea.vmem [#allocation9], %s3043_s18  ;;  %s2937_s21 = smov [#allocation18]  }
  0x58   :  { %2393 = vmatprep.subr.mxu0 %v2933_v1  ;;  %2426 = vmatprep.subr.mxu1 %v2933_v1  ;;  %136 = vst [vmem:[#allocation2 + $0x1] sm:$0x1] %v135_v12  ;;  %v139_v13 = vld [vmem:[%s138_s30] sm:$0x1]  ;;  %s142_s11 = scalar_lea.vmem [#allocation9], %s3047_s19  ;;  %s2215_s22 = sshll.u32 %s2937_s21, 4  ;;  %s2216_s22 = int_to_ptr.vmem [resolvable:$true] %s2215_s22 }
  0x59   :  { %2394 = vmatpush3.msra.mxu0 %v173_v8  ;;  %2427 = vmatpush3.msra.mxu1 %v3065_v9  ;;  %140 = vst [vmem:[#allocation2 + $0x2] sm:$0x1] %v139_v13  ;;  %v143_v15 = vld [vmem:[%s142_s11] sm:$0x1]  ;;  %s146_s5 = scalar_lea.vmem [#allocation9], %s3053_s25  ;;  %p2897_p3 = scmp.lt.s32.totalorder %s2216_s22, %s2216_s22 }
  0x5a   :  { %2395 = vmatprep.subr.mxu0 %v2933_v1  ;;  %144 = vst [vmem:[#allocation2 + $0x3] sm:$0x1] %v143_v15  ;;  %v147_v16 = vld [vmem:[%s146_s5] sm:$0x1]  ;;  %2429 = vmatmul.mubr.f32.vlgmr.msra.gmra.mxu1 %v2933_v1  ;;  %s150_s12 = scalar_lea.vmem [#allocation9], %s3058_s26 }
  0x5b   :  { %2396 = vmatpush3.msra.mxu0 %v172_v11  ;;  %148 = vst [vmem:[#allocation2 + $0x4] sm:$0x1] %v147_v16  ;;  %v151_v18 = vld [vmem:[%s150_s12] sm:$0x1]  ;;  %2431 = vmatprep.subr.mxu1 %v2933_v1  ;;  %s154_s0 = scalar_lea.vmem [#allocation9], %s3062_s27 }
  0x5c   :  { %2397 = vmatprep.subr.mxu0 %v2933_v1  ;;  %152 = vst [vmem:[#allocation2 + $0x5] sm:$0x1] %v151_v18  ;;  %v155_v19 = vld [vmem:[%s154_s0] sm:$0x1]  ;;  %2432 = vmatpush3.msra.mxu1 %v3045_v4  ;;  %s158_s13 = scalar_lea.vmem [#allocation9], %s3068_s28 }
  0x5d   :  { %2398 = vmatpush3.msra.mxu0 %v171_v14  ;;  %156 = vst [vmem:[#allocation2 + $0x6] sm:$0x1] %v155_v19  ;;  %v159_v21 = vld [vmem:[%s158_s13] sm:$0x1]  ;;  %2433 = vmatprep.subr.mxu1 %v2933_v1 }
  0x5e   :  { %2399 = vmatprep.subr.mxu0 %v2933_v1  ;;  %160 = vst [vmem:[#allocation2 + $0x7] sm:$0x1] %v159_v21  ;;  %2434 = vmatpush3.msra.mxu1 %v3051_v6  ;;  %v2243_v32 = vld [vmem:[%s3440_s4] ss:$0 sm:$0xff]  ;;  %s2936_s4 = smov 32  }
  0x5f   :  { %2400 = vmatpush3.msra.mxu0 %v170_v17  ;;  %2435 = vmatprep.subr.mxu1 %v2933_v1 }
  0x60   :  { %2401 = vmatprep.subr.mxu0 %v2933_v1  ;;  %2436 = vmatpush3.msra.mxu1 %v3056_v7 }
  0x61   :  { %2402 = vmatpush3.msra.mxu0 %v169_v20  ;;  %2437 = vmatprep.subr.mxu1 %v2933_v1 }
  0x62   :  { %2403 = vmatprep.subr.mxu0 %v2933_v1  ;;  %2438 = vmatpush3.msra.mxu1 %v3065_v9 }
  0x63   :  { %2404 = vmatpush3.msra.mxu0 %v168_v22  ;;  %2439 = vmatprep.mubr.msk.f32.mxu1 %vm2934_vm0, %v2933_v1 }
  0x64   :  { %2405 = vmatprep.subr.mxu0 %v2933_v1  ;;  %2442 = vmatprep.subr.mxu1 %v2933_v1 }
  0x65   :  { %2406 = vmatpush3.msra.mxu0 %v167_v23  ;;  %v161_v29 = vld [vmem:[#allocation2] sm:$0xff] }
  0x66   :  { %2407 = vmatprep.subr.mxu0 %v2933_v1 }
  0x67   :  { %2408 = vmatpush3.msra.mxu0 %v166_v24 }
  0x68   :  { %2409 = vmatprep.subr.mxu0 %v2933_v1 }
  0x69   :  { %2410 = vmatpush3.msra.mxu0 %v165_v25 }
  0x6a   :  { %2411 = vmatprep.subr.mxu0 %v2933_v1 }
  0x6b   :  { %2412 = vmatpush3.msra.mxu0 %v164_v26 }
  0x6c   :  { %2413 = vmatprep.subr.mxu0 %v2933_v1 }
  0x6d   :  { %2414 = vmatpush3.msra.mxu0 %v163_v27 }
  0x6e   :  { %2415 = vmatprep.subr.mxu0 %v2933_v1 }
  0x6f   :  { %2416 = vmatpush3.msra.mxu0 %v162_v28 }
  0x70   :  { %2418 = vmatmul.mubr.f32.vlgmr.msra.gmra.mxu0 %v161_v29  ;;  %2464 = vmatprep.subr.mxu0 %v2933_v1 }
  0x71   :  { %2465 = vmatpush3.msra.mxu0 %v3045_v4  ;;  %2472 = vmatprep.mubr.msk.f32.mxu0 %vm2934_vm0, %v2933_v1 }
  0x72   :  { %2466 = vmatprep.subr.mxu0 %v2933_v1 }
  0x73   :  { %2467 = vmatpush3.msra.mxu0 %v3051_v6 }
  0x74   :  { %2468 = vmatprep.subr.mxu0 %v2933_v1 }
  0x75   :  { %2469 = vmatpush3.msra.mxu0 %v3056_v7 }
  0x76   :  { %2470 = vmatprep.subr.mxu0 %v2933_v1 }
  0x77   :  { %2471 = vmatpush3.msra.mxu0 %v3065_v9 }
  0x78   :  { %2486 = vmatprep.subr.mxu0 %v2933_v1 }
 0x11a   :  { %v329_v30 = vpop.f32.mrf.mxu1 }
 0x11c   :  { %v2430_v31 = vpop.f32.mrf.mxu1 }
 0x130   :  { %v251_v33 = vpop.f32.mrf.mxu0 }
 0x131   :  { %v3118_v34 = vadd.f32 %v2243_v32, %v251_v33 }
 0x132   :  { %v2419_v35 = vpop.f32.mrf.mxu0 }
 0x133   :  { %v333_v36 = vadd.f32 %v329_v30, %v3118_v34 }
 0x135   :  { %2632 = vtanh.f32 %v333_v36  ;;  %v2244_v38 = vmul.f32 -1.442695, %v333_v36 }
 0x137   :  { %2634 = vpow2.f32 %v2244_v38 }
 0x142   :  { %v2633_v37 = vpop.eup %2632 }
 0x143   :  { %343 = vrot.lane.b32.xlu0 %v2633_v37, %s2935_s16 }
 0x144   :  { %v2635_v39 = vpop.eup %2634 }
 0x145   :  { %v337_v40 = vadd.f32 1.0, %v2635_v39 }
 0x147   :  { %2636 = vrcp.f32 %v337_v40 }
 0x154   :  { %v2637_v41 = vpop.eup %2636 }
 0x155   :  { %v341_v44 = vmul.f32 0.0, %v2637_v41 }
 0x1b5   :  { %v344_v42 = vpop.permute.xlu0 %343 }
 0x1b6   :  { %v346_v43 = vmul.f32 %v2637_v41, %v344_v42 }
 0x1b8   :  { %348 = vrot.lane.b32.xlu0 %v346_v43, %s2936_s4 }
 0x22a   :  { %v349_v45 = vpop.permute.xlu0 %348 }
 0x22b   :  { %v351_v46 = vadd.f32 %v349_v45, %v341_v44 }
 0x22d   :  { %2638 = vtanh.f32 %v351_v46  ;;  %v448_v62 = vrot.slane %v351_v46, 7 }
 0x23a   :  { %v2639_v47 = vpop.eup %2638 }
 0x23b   :  { %354 = vrot.lane.b32.xlu1 %v2639_v47, %s2935_s16 }
 0x2ad   :  { %v355_v48 = vpop.permute.xlu1 %354 }
 0x2ae   :  { %v357_v49 = vmul.f32 %v2637_v41, %v355_v48 }
 0x2b0   :  { %359 = vrot.lane.b32.xlu1 %v357_v49, %s2936_s4 }
 0x322   :  { %v360_v50 = vpop.permute.xlu1 %359 }
 0x323   :  { %363 = vst.msk [vmem:[#allocation3] sm:$0x1] %vm362_vm1, %v360_v50  ;;  %2440 = vmatmul.mubr.msk.f32.vlgmr.msra.gmra.mxu1 %vm259_vm2, %v360_v50 }
 0x324   :  { %2443 = vmatpush3.msra.mxu1 %v3045_v4  ;;  %2450 = vmatprep.mubr.msk.f32.mxu1 %vm2934_vm0, %v2933_v1 }
 0x325   :  { %2444 = vmatprep.subr.mxu1 %v2933_v1 }
 0x326   :  { %2445 = vmatpush3.msra.mxu1 %v3051_v6 }
 0x327   :  { %2446 = vmatprep.subr.mxu1 %v2933_v1 }
 0x328   :  { %2447 = vmatpush3.msra.mxu1 %v3056_v7 }
 0x329   :  { %2448 = vmatprep.subr.mxu1 %v2933_v1 }
 0x32a   :  { %2449 = vmatpush3.msra.mxu1 %v3065_v9 }
 0x32b   :  { %2453 = vmatprep.subr.mxu1 %v2933_v1 }
 0x3e3   :  { %v432_v51 = vpop.f32.mrf.mxu1 }
 0x3e4   :  { %v437_v52 = vrot.slane %v432_v51, 7 }
 0x3e5   :  { %v2441_v53 = vpop.f32.mrf.mxu1 }
 0x3e6   :  { %v439_v54 = vadd.f32 %v437_v52, %v3118_v34 }
 0x3e8   :  { %2640 = vtanh.f32 %v439_v54  ;;  %v2246_v56 = vmul.f32 -1.442695, %v439_v54 }
 0x3ea   :  { %2642 = vpow2.f32 %v2246_v56 }
 0x3f5   :  { %v2641_v55 = vpop.eup %2640 }
 0x3f6   :  { %452 = vrot.lane.b32.xlu0 %v2641_v55, %s2935_s16 }
 0x3f7   :  { %v2643_v57 = vpop.eup %2642 }
 0x3f8   :  { %v443_v58 = vadd.f32 1.0, %v2643_v57 }
 0x3fa   :  { %2644 = vrcp.f32 %v443_v58 }
 0x407   :  { %v2645_v59 = vpop.eup %2644 }
 0x408   :  { %v450_v63 = vmul.f32 %v2645_v59, %v448_v62 }
 0x468   :  { %v453_v60 = vpop.permute.xlu0 %452 }
 0x469   :  { %v455_v61 = vmul.f32 %v2645_v59, %v453_v60 }
 0x46b   :  { %457 = vrot.lane.b32.xlu1 %v455_v61, %s2936_s4 }
 0x4dd   :  { %v458_v0 = vpop.permute.xlu1 %457 }
 0x4de   :  { %v460_v2 = vadd.f32 %v458_v0, %v450_v63 }
 0x4e0   :  { %2646 = vtanh.f32 %v460_v2  ;;  %v560_v23 = vrot.slane %v460_v2, 7 }
 0x4ed   :  { %v2647_v3 = vpop.eup %2646 }
 0x4ee   :  { %463 = vrot.lane.b32.xlu0 %v2647_v3, %s2935_s16 }
 0x560   :  { %v464_v5 = vpop.permute.xlu0 %463 }
 0x561   :  { %v3141_v8 = vmul.f32 %v2645_v59, %v464_v5 }
 0x563   :  { %v473_v10 = vrot.slane %v3141_v8, 1 }
 0x565   :  { %474 = vrot.lane.b32.xlu1 %v473_v10, %s2936_s4 }
 0x5d7   :  { %v475_v11 = vpop.permute.xlu1 %474 }
 0x5d8   :  { %2451 = vmatmul.mubr.msk.f32.vlgmr.msra.gmra.mxu1 %vm259_vm2, %v475_v11 }
 0x5d9   :  { %2454 = vmatpush3.msra.mxu1 %v3045_v4  ;;  %2461 = vmatprep.mubr.msk.f32.mxu1 %vm2934_vm0, %v2933_v1 }
 0x5da   :  { %2455 = vmatprep.subr.mxu1 %v2933_v1 }
 0x5db   :  { %2456 = vmatpush3.msra.mxu1 %v3051_v6 }
 0x5dc   :  { %2457 = vmatprep.subr.mxu1 %v2933_v1 }
 0x5dd   :  { %2458 = vmatpush3.msra.mxu1 %v3056_v7 }
 0x5de   :  { %2459 = vmatprep.subr.mxu1 %v2933_v1 }
 0x5df   :  { %2460 = vmatpush3.msra.mxu1 %v3065_v9 }
 0x5e0   :  { %2475 = vmatprep.subr.mxu1 %v2933_v1 }
 0x698   :  { %v544_v12 = vpop.f32.mrf.mxu1 }
 0x699   :  { %v549_v13 = vrot.slane %v544_v12, 6 }
 0x69a   :  { %v2452_v14 = vpop.f32.mrf.mxu1 }
 0x69b   :  { %v551_v15 = vadd.f32 %v549_v13, %v3118_v34 }
 0x69d   :  { %2648 = vtanh.f32 %v551_v15  ;;  %v2248_v17 = vmul.f32 -1.442695, %v551_v15 }
 0x69f   :  { %2650 = vpow2.f32 %v2248_v17 }
 0x6aa   :  { %v2649_v16 = vpop.eup %2648 }
 0x6ab   :  { %564 = vrot.lane.b32.xlu0 %v2649_v16, %s2935_s16 }
 0x6ac   :  { %v2651_v18 = vpop.eup %2650 }
 0x6ad   :  { %v555_v19 = vadd.f32 1.0, %v2651_v18 }
 0x6af   :  { %2652 = vrcp.f32 %v555_v19 }
 0x6bc   :  { %v2653_v20 = vpop.eup %2652 }
 0x6bd   :  { %v562_v24 = vmul.f32 %v2653_v20, %v560_v23 }
 0x71d   :  { %v565_v21 = vpop.permute.xlu0 %564 }
 0x71e   :  { %v567_v22 = vmul.f32 %v2653_v20, %v565_v21 }
 0x720   :  { %569 = vrot.lane.b32.xlu1 %v567_v22, %s2936_s4 }
 0x792   :  { %v570_v25 = vpop.permute.xlu1 %569 }
 0x793   :  { %v572_v26 = vadd.f32 %v570_v25, %v562_v24 }
 0x795   :  { %2654 = vtanh.f32 %v572_v26  ;;  %v672_v44 = vrot.slane %v572_v26, 7 }
 0x7a2   :  { %v2655_v27 = vpop.eup %2654 }
 0x7a3   :  { %575 = vrot.lane.b32.xlu0 %v2655_v27, %s2935_s16 }
 0x815   :  { %v576_v28 = vpop.permute.xlu0 %575 }
 0x816   :  { %v3160_v29 = vmul.f32 %v2653_v20, %v576_v28 }
 0x818   :  { %v585_v30 = vrot.slane %v3160_v29, 2 }
 0x81a   :  { %586 = vrot.lane.b32.xlu1 %v585_v30, %s2936_s4 }
 0x88c   :  { %v587_v31 = vpop.permute.xlu1 %586 }
 0x88d   :  { %2462 = vmatmul.mubr.msk.f32.vlgmr.msra.gmra.mxu1 %vm259_vm2, %v587_v31 }
 0x88e   :  { %2476 = vmatpush3.msra.mxu1 %v3045_v4  ;;  %2483 = vmatprep.mubr.msk.f32.mxu1 %vm2934_vm0, %v2933_v1 }
 0x88f   :  { %2477 = vmatprep.subr.mxu1 %v2933_v1 }
 0x890   :  { %2478 = vmatpush3.msra.mxu1 %v3051_v6 }
 0x891   :  { %2479 = vmatprep.subr.mxu1 %v2933_v1 }
 0x892   :  { %2480 = vmatpush3.msra.mxu1 %v3056_v7 }
 0x893   :  { %2481 = vmatprep.subr.mxu1 %v2933_v1 }
 0x894   :  { %2482 = vmatpush3.msra.mxu1 %v3065_v9 }
 0x895   :  { %2497 = vmatprep.subr.mxu1 %v2933_v1 }
 0x94d   :  { %v656_v32 = vpop.f32.mrf.mxu1 }
 0x94e   :  { %v661_v33 = vrot.slane %v656_v32, 5 }
 0x94f   :  { %v2463_v35 = vpop.f32.mrf.mxu1 }
 0x950   :  { %v663_v36 = vadd.f32 %v661_v33, %v3118_v34 }
 0x952   :  { %2656 = vtanh.f32 %v663_v36  ;;  %v2250_v38 = vmul.f32 -1.442695, %v663_v36 }
 0x954   :  { %2658 = vpow2.f32 %v2250_v38 }
 0x95f   :  { %v2657_v37 = vpop.eup %2656 }
 0x960   :  { %676 = vrot.lane.b32.xlu0 %v2657_v37, %s2935_s16 }
 0x961   :  { %v2659_v39 = vpop.eup %2658 }
 0x962   :  { %v667_v40 = vadd.f32 1.0, %v2659_v39 }
 0x964   :  { %2660 = vrcp.f32 %v667_v40 }
 0x971   :  { %v2661_v41 = vpop.eup %2660 }
 0x972   :  { %v674_v45 = vmul.f32 %v2661_v41, %v672_v44 }
 0x9d2   :  { %v677_v42 = vpop.permute.xlu0 %676 }
 0x9d3   :  { %v679_v43 = vmul.f32 %v2661_v41, %v677_v42 }
 0x9d5   :  { %681 = vrot.lane.b32.xlu1 %v679_v43, %s2936_s4 }
 0xa47   :  { %v682_v46 = vpop.permute.xlu1 %681 }
 0xa48   :  { %v684_v47 = vadd.f32 %v682_v46, %v674_v45 }
 0xa4a   :  { %2662 = vtanh.f32 %v684_v47  ;;  %v784_v0 = vrot.slane %v684_v47, 7 }
 0xa57   :  { %v2663_v48 = vpop.eup %2662 }
 0xa58   :  { %687 = vrot.lane.b32.xlu0 %v2663_v48, %s2935_s16 }
 0xaca   :  { %v688_v49 = vpop.permute.xlu0 %687 }
 0xacb   :  { %v3179_v50 = vmul.f32 %v2661_v41, %v688_v49 }
 0xacd   :  { %v697_v51 = vrot.slane %v3179_v50, 3 }
 0xacf   :  { %698 = vrot.lane.b32.xlu1 %v697_v51, %s2936_s4 }
 0xb41   :  { %v699_v52 = vpop.permute.xlu1 %698 }
 0xb42   :  { %2473 = vmatmul.mubr.msk.f32.vlgmr.msra.gmra.mxu0 %vm259_vm2, %v699_v52 }
 0xb43   :  { %2487 = vmatpush3.msra.mxu0 %v3045_v4  ;;  %2494 = vmatprep.mubr.msk.f32.mxu0 %vm2934_vm0, %v2933_v1 }
 0xb44   :  { %2488 = vmatprep.subr.mxu0 %v2933_v1 }
 0xb45   :  { %2489 = vmatpush3.msra.mxu0 %v3051_v6 }
 0xb46   :  { %2490 = vmatprep.subr.mxu0 %v2933_v1 }
 0xb47   :  { %2491 = vmatpush3.msra.mxu0 %v3056_v7 }
 0xb48   :  { %2492 = vmatprep.subr.mxu0 %v2933_v1 }
 0xb49   :  { %2493 = vmatpush3.msra.mxu0 %v3065_v9 }
 0xb4a   :  { %2508 = vmatprep.subr.mxu0 %v2933_v1 }
 0xc02   :  { %v768_v53 = vpop.f32.mrf.mxu0 }
 0xc03   :  { %v773_v54 = vrot.slane %v768_v53, 4 }
 0xc04   :  { %v2474_v55 = vpop.f32.mrf.mxu0 }
 0xc05   :  { %v775_v56 = vadd.f32 %v773_v54, %v3118_v34 }
 0xc07   :  { %2664 = vtanh.f32 %v775_v56  ;;  %v2252_v58 = vmul.f32 -1.442695, %v775_v56 }
 0xc09   :  { %2666 = vpow2.f32 %v2252_v58 }
 0xc14   :  { %v2665_v57 = vpop.eup %2664 }
 0xc15   :  { %788 = vrot.lane.b32.xlu0 %v2665_v57, %s2935_s16 }
 0xc16   :  { %v2667_v59 = vpop.eup %2666 }
 0xc17   :  { %v779_v60 = vadd.f32 1.0, %v2667_v59 }
 0xc19   :  { %2668 = vrcp.f32 %v779_v60 }
 0xc26   :  { %v2669_v61 = vpop.eup %2668 }
 0xc27   :  { %v786_v2 = vmul.f32 %v2669_v61, %v784_v0 }
 0xc87   :  { %v789_v62 = vpop.permute.xlu0 %788 }
 0xc88   :  { %v791_v63 = vmul.f32 %v2669_v61, %v789_v62 }
 0xc8a   :  { %793 = vrot.lane.b32.xlu1 %v791_v63, %s2936_s4 }
 0xcfc   :  { %v794_v3 = vpop.permute.xlu1 %793 }
 0xcfd   :  { %v796_v5 = vadd.f32 %v794_v3, %v786_v2 }
 0xcff   :  { %2670 = vtanh.f32 %v796_v5 }
 0xd0c   :  { %v2671_v10 = vpop.eup %2670 }
 0xd0d   :  { %799 = vrot.lane.b32.xlu0 %v2671_v10, %s2935_s16 }
 0xd7f   :  { %v800_v11 = vpop.permute.xlu0 %799 }
 0xd80   :  { %v3198_v12 = vmul.f32 %v2669_v61, %v800_v11 }
 0xd82   :  { %v809_v13 = vrot.slane %v3198_v12, 4 }
 0xd84   :  { %810 = vrot.lane.b32.xlu1 %v809_v13, %s2936_s4  ;;  %v1149_v13 = vld [vmem:[#allocation13 + $0x18] sm:$0xff] }
 0xdf6   :  { %v811_v14 = vpop.permute.xlu1 %810 }
 0xdf7   :  { %2484 = vmatmul.mubr.msk.f32.vlgmr.msra.gmra.mxu1 %vm259_vm2, %v811_v14  ;;  %v3246_v14 = vld [vmem:[#allocation15 + $0x18] sm:$0xff] }
 0xdf8   :  { %2498 = vmatpush3.msra.mxu1 %v3045_v4  ;;  %2505 = vmatprep.mubr.msk.f32.mxu1 %vm2934_vm0, %v2933_v1 }
 0xdf9   :  { %2499 = vmatprep.subr.mxu1 %v2933_v1 }
 0xdfa   :  { %2500 = vmatpush3.msra.mxu1 %v3051_v6 }
 0xdfb   :  { %2501 = vmatprep.subr.mxu1 %v2933_v1 }
 0xdfc   :  { %2502 = vmatpush3.msra.mxu1 %v3056_v7 }
 0xdfd   :  { %2503 = vmatprep.subr.mxu1 %v2933_v1 }
 0xdfe   :  { %2504 = vmatpush3.msra.mxu1 %v3065_v9  ;;  %v896_v9 = vrot.slane %v796_v5, 7 }
 0xdff   :  { %2519 = vmatprep.subr.mxu1 %v2933_v1 }
 0xeb7   :  { %v880_v15 = vpop.f32.mrf.mxu1 }
 0xeb8   :  { %v885_v16 = vrot.slane %v880_v15, 3  ;;  %v1148_v15 = vld [vmem:[#allocation13 + $0x10] sm:$0xff] }
 0xeb9   :  { %v2485_v4 = vpop.f32.mrf.mxu1 }
 0xeba   :  { %v887_v17 = vadd.f32 %v885_v16, %v3118_v34  ;;  %v3249_v16 = vld [vmem:[#allocation15 + $0x10] sm:$0xff]  ;;  %v1147_v4 = vld [vmem:[#allocation13 + $0x8] sm:$0xff] }
 0xebc   :  { %2672 = vtanh.f32 %v887_v17  ;;  %v2254_v6 = vmul.f32 -1.442695, %v887_v17  ;;  %v3258_v17 = vld [vmem:[#allocation15] sm:$0xff] }
 0xebe   :  { %2674 = vpow2.f32 %v2254_v6 }
 0xec9   :  { %v2673_v18 = vpop.eup %2672 }
 0xeca   :  { %900 = vrot.lane.b32.xlu0 %v2673_v18, %s2935_s16 }
 0xecb   :  { %v2675_v19 = vpop.eup %2674 }
 0xecc   :  { %v891_v20 = vadd.f32 1.0, %v2675_v19 }
 0xece   :  { %2676 = vrcp.f32 %v891_v20 }
 0xedb   :  { %v2677_v7 = vpop.eup %2676 }
 0xedc   :  { %v898_v23 = vmul.f32 %v2677_v7, %v896_v9 }
 0xf3c   :  { %v901_v21 = vpop.permute.xlu0 %900 }
 0xf3d   :  { %v903_v22 = vmul.f32 %v2677_v7, %v901_v21 }
 0xf3f   :  { %905 = vrot.lane.b32.xlu1 %v903_v22, %s2936_s4 }
 0xfb1   :  { %v906_v24 = vpop.permute.xlu1 %905 }
 0xfb2   :  { %v908_v25 = vadd.f32 %v906_v24, %v898_v23  ;;  %v2259_v24 = vld [vmem:[%s3443_s7] ss:$0 sm:$0xff] }
 0xfb4   :  { %2678 = vtanh.f32 %v908_v25  ;;  %v1008_v44 = vrot.slane %v908_v25, 7 }
 0xfc1   :  { %v2679_v26 = vpop.eup %2678 }
 0xfc2   :  { %911 = vrot.lane.b32.xlu0 %v2679_v26, %s2935_s16 }
0x1034   :  { %v912_v27 = vpop.permute.xlu0 %911 }
0x1035   :  { %v914_v28 = vmul.f32 %v2677_v7, %v912_v27 }
0x1037   :  { %v921_v30 = vrot.slane %v914_v28, 5 }
0x1039   :  { %922 = vrot.lane.b32.xlu1 %v921_v30, %s2936_s4 }
0x10ab   :  { %v923_v31 = vpop.permute.xlu1 %922 }
0x10ac   :  { %2495 = vmatmul.mubr.msk.f32.vlgmr.msra.gmra.mxu0 %vm259_vm2, %v923_v31 }
0x10ad   :  { %2516 = vmatprep.mubr.msk.f32.mxu0 %vm2934_vm0, %v2933_v1  ;;  %2509 = vmatpush3.msra.mxu0 %v1149_v13 }
0x10ae   :  { %2510 = vmatprep.subr.mxu0 %v2933_v1 }
0x10af   :  { %2511 = vmatpush3.msra.mxu0 %v1148_v15 }
0x10b0   :  { %2512 = vmatprep.subr.mxu0 %v2933_v1 }
0x10b1   :  { %2513 = vmatpush3.msra.mxu0 %v1147_v4 }
0x10b2   :  { %2514 = vmatprep.subr.mxu0 %v2933_v1 }
0x116c   :  { %v992_v32 = vpop.f32.mrf.mxu0 }
0x116d   :  { %v997_v33 = vrot.slane %v992_v32, 2 }
0x116e   :  { %v2496_v35 = vpop.f32.mrf.mxu0 }
0x116f   :  { %v999_v36 = vadd.f32 %v997_v33, %v3118_v34 }
0x1171   :  { %2680 = vtanh.f32 %v999_v36  ;;  %v2256_v38 = vmul.f32 -1.442695, %v999_v36 }
0x1173   :  { %2682 = vpow2.f32 %v2256_v38 }
0x117e   :  { %v2681_v37 = vpop.eup %2680 }
0x117f   :  { %1012 = vrot.lane.b32.xlu0 %v2681_v37, %s2935_s16 }
0x1180   :  { %v2683_v39 = vpop.eup %2682 }
0x1181   :  { %v1003_v40 = vadd.f32 1.0, %v2683_v39 }
0x1183   :  { %2684 = vrcp.f32 %v1003_v40 }
0x1190   :  { %v2685_v41 = vpop.eup %2684 }
0x1191   :  { %v1010_v45 = vmul.f32 %v2685_v41, %v1008_v44 }
0x11f1   :  { %v1013_v42 = vpop.permute.xlu0 %1012 }
0x11f2   :  { %v1015_v43 = vmul.f32 %v2685_v41, %v1013_v42 }
0x11f4   :  { %1017 = vrot.lane.b32.xlu1 %v1015_v43, %s2936_s4 }
0x1266   :  { %v1018_v46 = vpop.permute.xlu1 %1017 }
0x1267   :  { %v1020_v47 = vadd.f32 %v1018_v46, %v1010_v45 }
0x1269   :  { %2686 = vtanh.f32 %v1020_v47 }
0x1276   :  { %v2687_v48 = vpop.eup %2686 }
0x1277   :  { %1023 = vrot.lane.b32.xlu0 %v2687_v48, %s2935_s16 }
0x12e9   :  { %v1024_v49 = vpop.permute.xlu0 %1023 }
0x12ea   :  { %v1026_v51 = vmul.f32 %v2685_v41, %v1024_v49 }
0x12ec   :  { %v1033_v52 = vrot.slane %v1026_v51, 6 }
0x12ee   :  { %1034 = vrot.lane.b32.xlu1 %v1033_v52, %s2936_s4 }
0x1360   :  { %v1035_v53 = vpop.permute.xlu1 %1034 }
0x1361   :  { %2506 = vmatmul.mubr.msk.f32.vlgmr.msra.gmra.mxu1 %vm259_vm2, %v1035_v53 }
0x1362   :  { %2527 = vmatprep.mubr.msk.f32.mxu1 %vm2934_vm0, %v2933_v1  ;;  %2520 = vmatpush3.msra.mxu1 %v3246_v14 }
0x1363   :  { %2521 = vmatprep.subr.mxu1 %v2933_v1 }
0x1364   :  { %2522 = vmatpush3.msra.mxu1 %v3249_v16 }
0x1365   :  { %2523 = vmatprep.subr.mxu1 %v2933_v1 }
0x1421   :  { %v1104_v54 = vpop.f32.mrf.mxu1 }
0x1422   :  { %v1109_v55 = vrot.slane %v1104_v54, 1 }
0x1423   :  { %v2507_v56 = vpop.f32.mrf.mxu1 }
0x1424   :  { %v1111_v57 = vadd.f32 %v1109_v55, %v3118_v34  ;;  %v1120_v34 = vrot.slane %v1020_v47, 7 }
0x1426   :  { %2688 = vtanh.f32 %v1111_v57  ;;  %v2258_v59 = vmul.f32 -1.442695, %v1111_v57 }
0x1428   :  { %2690 = vpow2.f32 %v2258_v59 }
0x1433   :  { %v2689_v58 = vpop.eup %2688 }
0x1434   :  { %1124 = vrot.lane.b32.xlu0 %v2689_v58, %s2935_s16 }
0x1435   :  { %v2691_v60 = vpop.eup %2690 }
0x1436   :  { %v1115_v61 = vadd.f32 1.0, %v2691_v60 }
0x1438   :  { %2692 = vrcp.f32 %v1115_v61 }
0x1445   :  { %v2693_v62 = vpop.eup %2692 }
0x1446   :  { %v1122_v2 = vmul.f32 %v2693_v62, %v1120_v34 }
0x14a6   :  { %v1125_v63 = vpop.permute.xlu0 %1124 }
0x14a7   :  { %v1127_v0 = vmul.f32 %v2693_v62, %v1125_v63 }
0x14a9   :  { %1129 = vrot.lane.b32.xlu1 %v1127_v0, %s2936_s4 }
0x14ad   :  { %468 = vrot.lane.b32.xlu1 %v3141_v8, %s2936_s4 }
0x14b1   :  { %692 = vrot.lane.b32.xlu1 %v3179_v50, %s2936_s4 }
0x14b5   :  { %916 = vrot.lane.b32.xlu1 %v914_v28, %s2936_s4 }
0x151b   :  { %v1130_v3 = vpop.permute.xlu1 %1129 }
0x151c   :  { %v1132_v5 = vadd.f32 %v1130_v3, %v1122_v2 }
0x151e   :  { %2694 = vtanh.f32 %v1132_v5 }
0x151f   :  { %v469_v10 = vpop.permute.xlu1 %468 }
0x1520   :  { %472 = vst.msk [vmem:[#allocation3] sm:$0x2] %vm471_vm3, %v469_v10 }
0x1523   :  { %v693_v11 = vpop.permute.xlu1 %692 }
0x1524   :  { %696 = vst.msk [vmem:[#allocation3] sm:$0x8] %vm695_vm4, %v693_v11 }
0x1527   :  { %v917_v8 = vpop.permute.xlu1 %916 }
0x1528   :  { %920 = vst.msk [vmem:[#allocation3] sm:$0x20] %vm919_vm5, %v917_v8 }
0x152b   :  { %v2695_v50 = vpop.eup %2694 }
0x152c   :  { %1135 = vrot.lane.b32.xlu0 %v2695_v50, %s2935_s16 }
0x1530   :  { %580 = vrot.lane.b32.xlu0 %v3160_v29, %s2936_s4  ;;  %v3253_v29 = vld [vmem:[#allocation15 + $0x8] sm:$0xff] }
0x1531   :  { %2524 = vmatpush3.msra.mxu1 %v3253_v29 }
0x1532   :  { %2525 = vmatprep.subr.mxu1 %v2933_v1 }
0x1533   :  { %2526 = vmatpush3.msra.mxu1 %v3258_v17 }
0x1534   :  { %804 = vrot.lane.b32.xlu0 %v3198_v12, %s2936_s4  ;;  %v1146_v12 = vld [vmem:[#allocation13] sm:$0xff]  ;;  %2528 = vmatmul.mubr.f32.vlgmr.msra.gmra.mxu1 %v2933_v1 }
0x1535   :  { %2515 = vmatpush3.msra.mxu0 %v1146_v12  ;;  %2541 = vmatprep.subr.mxu1 %v2933_v1 }
0x1536   :  { %2530 = vmatprep.subr.mxu0 %v2933_v1  ;;  %2549 = vmatprep.mubr.msk.f32.mxu1 %vm2934_vm0, %v2933_v1 }
0x1537   :  { %2542 = vmatpush3.msra.mxu1 %v3246_v14 }
0x1538   :  { %1028 = vrot.lane.b32.xlu0 %v1026_v51, %s2936_s4  ;;  %2543 = vmatprep.subr.mxu1 %v2933_v1 }
0x1539   :  { %2544 = vmatpush3.msra.mxu1 %v3249_v16 }
0x153a   :  { %2545 = vmatprep.subr.mxu1 %v2933_v1 }
0x153b   :  { %2546 = vmatpush3.msra.mxu1 %v3253_v29 }
0x153c   :  { %2547 = vmatprep.subr.mxu1 %v2933_v1 }
0x153d   :  { %2548 = vmatpush3.msra.mxu1 %v3258_v17 }
0x153e   :  { %2563 = vmatprep.subr.mxu1 %v2933_v1 }
0x159e   :  { %v1136_v18 = vpop.permute.xlu0 %1135 }
0x159f   :  { %v1138_v6 = vmul.f32 %v2693_v62, %v1136_v18 }
0x15a1   :  { %1140 = vrot.lane.b32.xlu1 %v1138_v6, %s2936_s4 }
0x15a2   :  { %v581_v19 = vpop.permute.xlu0 %580 }
0x15a3   :  { %584 = vst.msk [vmem:[#allocation3] sm:$0x4] %vm583_vm6, %v581_v19 }
0x15a6   :  { %v805_v20 = vpop.permute.xlu0 %804 }
0x15a7   :  { %808 = vst.msk [vmem:[#allocation3] sm:$0x10] %vm807_vm7, %v805_v20 }
0x15aa   :  { %v1029_v7 = vpop.permute.xlu0 %1028 }
0x15ab   :  { %1032 = vst.msk [vmem:[#allocation3] sm:$0x40] %vm1031_vm8, %v1029_v7 }
0x15f4   :  { %v1300_v9 = vpop.f32.mrf.mxu1 }
0x15f6   :  { %v2529_v23 = vpop.f32.mrf.mxu1 }
0x1613   :  { %v1141_v21 = vpop.permute.xlu1 %1140 }
0x1614   :  { %1144 = vst.msk [vmem:[#allocation3] sm:$0x80] %vm1143_vm9, %v1141_v21 }
0x161b   :  { %v1145_v22 = vld [vmem:[#allocation3] sm:$0xff] }
0x161c   :  { %2517 = vmatmul.mubr.msk.f32.vlgmr.msra.gmra.mxu0 %vm259_vm2, %v1145_v22 }
0x161d   :  { %2531 = vmatpush3.msra.mxu0 %v3246_v14  ;;  %2538 = vmatprep.mubr.msk.f32.mxu0 %vm2934_vm0, %v2933_v1 }
0x161e   :  { %2532 = vmatprep.subr.mxu0 %v2933_v1 }
0x161f   :  { %2533 = vmatpush3.msra.mxu0 %v3249_v16 }
0x1620   :  { %2534 = vmatprep.subr.mxu0 %v2933_v1 }
0x1621   :  { %2535 = vmatpush3.msra.mxu0 %v3253_v29 }
0x1622   :  { %2536 = vmatprep.subr.mxu0 %v2933_v1 }
0x1623   :  { %2537 = vmatpush3.msra.mxu0 %v3258_v17 }
0x1624   :  { %2552 = vmatprep.subr.mxu0 %v2933_v1 }
0x16dc   :  { %v1226_v25 = vpop.f32.mrf.mxu0 }
0x16dd   :  { %v3296_v26 = vadd.f32 %v2259_v24, %v1226_v25 }
0x16de   :  { %v2518_v27 = vpop.f32.mrf.mxu0 }
0x16df   :  { %v1304_v28 = vadd.f32 %v1300_v9, %v3296_v26 }
0x16e1   :  { %2696 = vtanh.f32 %v1304_v28  ;;  %v2261_v31 = vmul.f32 -1.442695, %v1304_v28 }
0x16e3   :  { %2698 = vpow2.f32 %v2261_v31 }
0x16ee   :  { %v2697_v30 = vpop.eup %2696 }
0x16ef   :  { %1314 = vrot.lane.b32.xlu0 %v2697_v30, %s2935_s16 }
0x16f0   :  { %v2699_v32 = vpop.eup %2698 }
0x16f1   :  { %v1308_v33 = vadd.f32 1.0, %v2699_v32 }
0x16f3   :  { %2700 = vrcp.f32 %v1308_v33 }
0x1700   :  { %v2701_v35 = vpop.eup %2700 }
0x1701   :  { %v1312_v38 = vmul.f32 0.0, %v2701_v35 }
0x1761   :  { %v1315_v36 = vpop.permute.xlu0 %1314 }
0x1762   :  { %v1317_v37 = vmul.f32 %v2701_v35, %v1315_v36 }
0x1764   :  { %1319 = vrot.lane.b32.xlu1 %v1317_v37, %s2936_s4 }
0x17d6   :  { %v1320_v39 = vpop.permute.xlu1 %1319 }
0x17d7   :  { %v1322_v40 = vadd.f32 %v1320_v39, %v1312_v38 }
0x17d9   :  { %2702 = vtanh.f32 %v1322_v40  ;;  %v1418_v57 = vrot.slane %v1322_v40, 7 }
0x17e6   :  { %v2703_v41 = vpop.eup %2702 }
0x17e7   :  { %1325 = vrot.lane.b32.xlu0 %v2703_v41, %s2935_s16 }
0x1859   :  { %v1326_v42 = vpop.permute.xlu0 %1325 }
0x185a   :  { %v1328_v43 = vmul.f32 %v2701_v35, %v1326_v42 }
0x185c   :  { %1330 = vrot.lane.b32.xlu1 %v1328_v43, %s2936_s4 }
0x18ce   :  { %v1331_v44 = vpop.permute.xlu1 %1330 }
0x18cf   :  { %1333 = vst.msk [vmem:[#allocation4] sm:$0x1] %vm362_vm1, %v1331_v44  ;;  %2539 = vmatmul.mubr.msk.f32.vlgmr.msra.gmra.mxu0 %vm259_vm2, %v1331_v44 }
0x18d0   :  { %2553 = vmatpush3.msra.mxu0 %v3246_v14  ;;  %2560 = vmatprep.mubr.msk.f32.mxu0 %vm2934_vm0, %v2933_v1 }
0x18d1   :  { %2554 = vmatprep.subr.mxu0 %v2933_v1 }
0x18d2   :  { %2555 = vmatpush3.msra.mxu0 %v3249_v16 }
0x18d3   :  { %2556 = vmatprep.subr.mxu0 %v2933_v1 }
0x18d4   :  { %2557 = vmatpush3.msra.mxu0 %v3253_v29 }
0x18d5   :  { %2558 = vmatprep.subr.mxu0 %v2933_v1 }
0x18d6   :  { %2559 = vmatpush3.msra.mxu0 %v3258_v17 }
0x18d7   :  { %2574 = vmatprep.subr.mxu0 %v2933_v1 }
0x198f   :  { %v1402_v45 = vpop.f32.mrf.mxu0 }
0x1990   :  { %v1407_v46 = vrot.slane %v1402_v45, 7 }
0x1991   :  { %v2540_v47 = vpop.f32.mrf.mxu0 }
0x1992   :  { %v1409_v48 = vadd.f32 %v1407_v46, %v3296_v26 }
0x1994   :  { %2704 = vtanh.f32 %v1409_v48  ;;  %v2263_v51 = vmul.f32 -1.442695, %v1409_v48 }
0x1996   :  { %2706 = vpow2.f32 %v2263_v51 }
0x19a1   :  { %v2705_v49 = vpop.eup %2704 }
0x19a2   :  { %1422 = vrot.lane.b32.xlu0 %v2705_v49, %s2935_s16 }
0x19a3   :  { %v2707_v52 = vpop.eup %2706 }
0x19a4   :  { %v1413_v53 = vadd.f32 1.0, %v2707_v52 }
0x19a6   :  { %2708 = vrcp.f32 %v1413_v53 }
0x19b3   :  { %v2709_v54 = vpop.eup %2708 }
0x19b4   :  { %v1420_v58 = vmul.f32 %v2709_v54, %v1418_v57 }
0x1a14   :  { %v1423_v55 = vpop.permute.xlu0 %1422 }
0x1a15   :  { %v1425_v56 = vmul.f32 %v2709_v54, %v1423_v55 }
0x1a17   :  { %1427 = vrot.lane.b32.xlu1 %v1425_v56, %s2936_s4 }
0x1a89   :  { %v1428_v59 = vpop.permute.xlu1 %1427 }
0x1a8a   :  { %v1430_v60 = vadd.f32 %v1428_v59, %v1420_v58 }
0x1a8c   :  { %2710 = vtanh.f32 %v1430_v60  ;;  %v1529_v18 = vrot.slane %v1430_v60, 7 }
0x1a99   :  { %v2711_v61 = vpop.eup %2710 }
0x1a9a   :  { %1433 = vrot.lane.b32.xlu0 %v2711_v61, %s2935_s16 }
0x1b0c   :  { %v1434_v62 = vpop.permute.xlu0 %1433 }
0x1b0d   :  { %v3319_v63 = vmul.f32 %v2709_v54, %v1434_v62 }
0x1b0f   :  { %v1442_v0 = vrot.slane %v3319_v63, 1 }
0x1b11   :  { %1443 = vrot.lane.b32.xlu1 %v1442_v0, %s2936_s4 }
0x1b83   :  { %v1444_v34 = vpop.permute.xlu1 %1443 }
0x1b84   :  { %2550 = vmatmul.mubr.msk.f32.vlgmr.msra.gmra.mxu1 %vm259_vm2, %v1444_v34 }
0x1b85   :  { %2564 = vmatpush3.msra.mxu1 %v3246_v14  ;;  %2571 = vmatprep.mubr.msk.f32.mxu1 %vm2934_vm0, %v2933_v1 }
0x1b86   :  { %2565 = vmatprep.subr.mxu1 %v2933_v1 }
0x1b87   :  { %2566 = vmatpush3.msra.mxu1 %v3249_v16 }
0x1b88   :  { %2567 = vmatprep.subr.mxu1 %v2933_v1 }
0x1b89   :  { %2568 = vmatpush3.msra.mxu1 %v3253_v29 }
0x1b8a   :  { %2569 = vmatprep.subr.mxu1 %v2933_v1 }
0x1b8b   :  { %2570 = vmatpush3.msra.mxu1 %v3258_v17 }
0x1b8c   :  { %2585 = vmatprep.subr.mxu1 %v2933_v1 }
0x1c44   :  { %v1513_v2 = vpop.f32.mrf.mxu1 }
0x1c45   :  { %v1518_v3 = vrot.slane %v1513_v2, 6 }
0x1c46   :  { %v2551_v5 = vpop.f32.mrf.mxu1 }
0x1c47   :  { %v1520_v10 = vadd.f32 %v1518_v3, %v3296_v26 }
0x1c49   :  { %2712 = vtanh.f32 %v1520_v10  ;;  %v2265_v8 = vmul.f32 -1.442695, %v1520_v10 }
0x1c4b   :  { %2714 = vpow2.f32 %v2265_v8 }
0x1c56   :  { %v2713_v11 = vpop.eup %2712 }
0x1c57   :  { %1533 = vrot.lane.b32.xlu0 %v2713_v11, %s2935_s16 }
0x1c58   :  { %v2715_v50 = vpop.eup %2714 }
0x1c59   :  { %v1524_v13 = vadd.f32 1.0, %v2715_v50 }
0x1c5b   :  { %2716 = vrcp.f32 %v1524_v13 }
0x1c68   :  { %v2717_v15 = vpop.eup %2716 }
0x1c69   :  { %v1531_v6 = vmul.f32 %v2717_v15, %v1529_v18 }
0x1cc9   :  { %v1534_v4 = vpop.permute.xlu0 %1533 }
0x1cca   :  { %v1536_v12 = vmul.f32 %v2717_v15, %v1534_v4 }
0x1ccc   :  { %1538 = vrot.lane.b32.xlu1 %v1536_v12, %s2936_s4 }
0x1d3e   :  { %v1539_v19 = vpop.permute.xlu1 %1538 }
0x1d3f   :  { %v1541_v20 = vadd.f32 %v1539_v19, %v1531_v6 }
0x1d41   :  { %2718 = vtanh.f32 %v1541_v20  ;;  %v1640_v38 = vrot.slane %v1541_v20, 7 }
0x1d4e   :  { %v2719_v7 = vpop.eup %2718 }
0x1d4f   :  { %1544 = vrot.lane.b32.xlu0 %v2719_v7, %s2935_s16 }
0x1dc1   :  { %v1545_v21 = vpop.permute.xlu0 %1544 }
0x1dc2   :  { %v3338_v22 = vmul.f32 %v2717_v15, %v1545_v21 }
0x1dc4   :  { %v1553_v9 = vrot.slane %v3338_v22, 2 }
0x1dc6   :  { %1554 = vrot.lane.b32.xlu1 %v1553_v9, %s2936_s4 }
0x1e38   :  { %v1555_v23 = vpop.permute.xlu1 %1554 }
0x1e39   :  { %2561 = vmatmul.mubr.msk.f32.vlgmr.msra.gmra.mxu0 %vm259_vm2, %v1555_v23 }
0x1e3a   :  { %2575 = vmatpush3.msra.mxu0 %v3246_v14  ;;  %2582 = vmatprep.mubr.msk.f32.mxu0 %vm2934_vm0, %v2933_v1 }
0x1e3b   :  { %2576 = vmatprep.subr.mxu0 %v2933_v1 }
0x1e3c   :  { %2577 = vmatpush3.msra.mxu0 %v3249_v16 }
0x1e3d   :  { %2578 = vmatprep.subr.mxu0 %v2933_v1 }
0x1e3e   :  { %2579 = vmatpush3.msra.mxu0 %v3253_v29 }
0x1e3f   :  { %2580 = vmatprep.subr.mxu0 %v2933_v1 }
0x1e40   :  { %2581 = vmatpush3.msra.mxu0 %v3258_v17 }
0x1e41   :  { %2596 = vmatprep.subr.mxu0 %v2933_v1 }
0x1ef9   :  { %v1624_v24 = vpop.f32.mrf.mxu0 }
0x1efa   :  { %v1629_v25 = vrot.slane %v1624_v24, 5 }
0x1efb   :  { %v2562_v27 = vpop.f32.mrf.mxu0 }
0x1efc   :  { %v1631_v28 = vadd.f32 %v1629_v25, %v3296_v26 }
0x1efe   :  { %2720 = vtanh.f32 %v1631_v28  ;;  %v2267_v31 = vmul.f32 -1.442695, %v1631_v28 }
0x1f00   :  { %2722 = vpow2.f32 %v2267_v31 }
0x1f0b   :  { %v2721_v30 = vpop.eup %2720 }
0x1f0c   :  { %1644 = vrot.lane.b32.xlu0 %v2721_v30, %s2935_s16 }
0x1f0d   :  { %v2723_v32 = vpop.eup %2722 }
0x1f0e   :  { %v1635_v33 = vadd.f32 1.0, %v2723_v32 }
0x1f10   :  { %2724 = vrcp.f32 %v1635_v33 }
0x1f1d   :  { %v2725_v35 = vpop.eup %2724 }
0x1f1e   :  { %v1642_v39 = vmul.f32 %v2725_v35, %v1640_v38 }
0x1f7e   :  { %v1645_v36 = vpop.permute.xlu0 %1644 }
0x1f7f   :  { %v1647_v37 = vmul.f32 %v2725_v35, %v1645_v36 }
0x1f81   :  { %1649 = vrot.lane.b32.xlu1 %v1647_v37, %s2936_s4 }
0x1ff3   :  { %v1650_v40 = vpop.permute.xlu1 %1649 }
0x1ff4   :  { %v1652_v41 = vadd.f32 %v1650_v40, %v1642_v39 }
0x1ff6   :  { %2726 = vtanh.f32 %v1652_v41  ;;  %v1751_v59 = vrot.slane %v1652_v41, 7 }
0x2003   :  { %v2727_v42 = vpop.eup %2726 }
0x2004   :  { %1655 = vrot.lane.b32.xlu0 %v2727_v42, %s2935_s16 }
0x2076   :  { %v1656_v43 = vpop.permute.xlu0 %1655 }
0x2077   :  { %v3357_v44 = vmul.f32 %v2725_v35, %v1656_v43 }
0x2079   :  { %v1664_v45 = vrot.slane %v3357_v44, 3 }
0x207b   :  { %1665 = vrot.lane.b32.xlu1 %v1664_v45, %s2936_s4 }
0x20ed   :  { %v1666_v46 = vpop.permute.xlu1 %1665 }
0x20ee   :  { %2572 = vmatmul.mubr.msk.f32.vlgmr.msra.gmra.mxu1 %vm259_vm2, %v1666_v46 }
0x20ef   :  { %2586 = vmatpush3.msra.mxu1 %v3246_v14  ;;  %2593 = vmatprep.mubr.msk.f32.mxu1 %vm2934_vm0, %v2933_v1 }
0x20f0   :  { %2587 = vmatprep.subr.mxu1 %v2933_v1 }
0x20f1   :  { %2588 = vmatpush3.msra.mxu1 %v3249_v16 }
0x20f2   :  { %2589 = vmatprep.subr.mxu1 %v2933_v1 }
0x20f3   :  { %2590 = vmatpush3.msra.mxu1 %v3253_v29 }
0x20f4   :  { %2591 = vmatprep.subr.mxu1 %v2933_v1 }
0x20f5   :  { %2592 = vmatpush3.msra.mxu1 %v3258_v17 }
0x20f6   :  { %2607 = vmatprep.subr.mxu1 %v2933_v1 }
0x21ae   :  { %v1735_v47 = vpop.f32.mrf.mxu1 }
0x21af   :  { %v1740_v48 = vrot.slane %v1735_v47, 4 }
0x21b0   :  { %v2573_v49 = vpop.f32.mrf.mxu1 }
0x21b1   :  { %v1742_v51 = vadd.f32 %v1740_v48, %v3296_v26 }
0x21b3   :  { %2728 = vtanh.f32 %v1742_v51  ;;  %v2269_v53 = vmul.f32 -1.442695, %v1742_v51 }
0x21b5   :  { %2730 = vpow2.f32 %v2269_v53 }
0x21c0   :  { %v2729_v52 = vpop.eup %2728 }
0x21c1   :  { %1755 = vrot.lane.b32.xlu0 %v2729_v52, %s2935_s16 }
0x21c2   :  { %v2731_v54 = vpop.eup %2730 }
0x21c3   :  { %v1746_v55 = vadd.f32 1.0, %v2731_v54 }
0x21c5   :  { %2732 = vrcp.f32 %v1746_v55 }
0x21d2   :  { %v2733_v56 = vpop.eup %2732 }
0x21d3   :  { %v1753_v60 = vmul.f32 %v2733_v56, %v1751_v59 }
0x2233   :  { %v1756_v57 = vpop.permute.xlu0 %1755 }
0x2234   :  { %v1758_v58 = vmul.f32 %v2733_v56, %v1756_v57 }
0x2236   :  { %1760 = vrot.lane.b32.xlu1 %v1758_v58, %s2936_s4 }
0x22a8   :  { %v1761_v61 = vpop.permute.xlu1 %1760 }
0x22a9   :  { %v1763_v62 = vadd.f32 %v1761_v61, %v1753_v60 }
0x22ab   :  { %2734 = vtanh.f32 %v1763_v62 }
0x22b8   :  { %v2735_v0 = vpop.eup %2734 }
0x22b9   :  { %1766 = vrot.lane.b32.xlu0 %v2735_v0, %s2935_s16 }
0x232b   :  { %v1767_v34 = vpop.permute.xlu0 %1766 }
0x232c   :  { %v3376_v2 = vmul.f32 %v2733_v56, %v1767_v34 }
0x232e   :  { %v1775_v3 = vrot.slane %v3376_v2, 4 }
0x2330   :  { %1776 = vrot.lane.b32.xlu1 %v1775_v3, %s2936_s4 }
0x23a2   :  { %v1777_v5 = vpop.permute.xlu1 %1776 }
0x23a3   :  { %2583 = vmatmul.mubr.msk.f32.vlgmr.msra.gmra.mxu0 %vm259_vm2, %v1777_v5  ;;  %v2111_v5 = vld [vmem:[#allocation16 + $0x10] sm:$0xff] }
0x23a4   :  { %2597 = vmatpush3.msra.mxu0 %v3246_v14  ;;  %2604 = vmatprep.mubr.msk.f32.mxu0 %vm2934_vm0, %v2933_v1 }
0x23a5   :  { %2598 = vmatprep.subr.mxu0 %v2933_v1 }
0x23a6   :  { %2599 = vmatpush3.msra.mxu0 %v3249_v16 }
0x23a7   :  { %2600 = vmatprep.subr.mxu0 %v2933_v1 }
0x23a8   :  { %2601 = vmatpush3.msra.mxu0 %v3253_v29 }
0x23a9   :  { %2602 = vmatprep.subr.mxu0 %v2933_v1 }
0x23aa   :  { %2603 = vmatpush3.msra.mxu0 %v3258_v17  ;;  %v1862_v17 = vrot.slane %v1763_v62, 7 }
0x2463   :  { %v1846_v10 = vpop.f32.mrf.mxu0 }
0x2464   :  { %v1851_v11 = vrot.slane %v1846_v10, 3  ;;  %v2110_v10 = vld [vmem:[#allocation16 + $0x8] sm:$0xff] }
0x2465   :  { %v2584_v8 = vpop.f32.mrf.mxu0 }
0x2466   :  { %v1853_v14 = vadd.f32 %v1851_v11, %v3296_v26  ;;  %v2109_v11 = vld [vmem:[#allocation16] sm:$0xff] }
0x2468   :  { %2736 = vtanh.f32 %v1853_v14  ;;  %v2271_v13 = vmul.f32 -1.442695, %v1853_v14 }
0x246a   :  { %2738 = vpow2.f32 %v2271_v13 }
0x2475   :  { %v2737_v50 = vpop.eup %2736 }
0x2476   :  { %1866 = vrot.lane.b32.xlu0 %v2737_v50, %s2935_s16 }
0x2477   :  { %v2739_v16 = vpop.eup %2738 }
0x2478   :  { %v1857_v15 = vadd.f32 1.0, %v2739_v16 }
0x247a   :  { %2740 = vrcp.f32 %v1857_v15  ;;  %v2276_v15 = vld [vmem:[%s3445_s9] ss:$0 sm:$0xff]  ;;  %s2892_s9 = scalar_lea.vmem %s2216_s22, 128 }
0x247b   :  { %p2893_p2 = scmp.ne.s32.totalorder %s2216_s22, %s2892_s9  ;;  %p2898_p4 = scmp.lt.s32.totalorder %s2892_s9, %s2892_s9 }
0x247d   :  { %p2899_p5 = por %p2898_p4, %p2897_p3 }
0x247f   :  { %p2900_p6 = pnand %p2899_p5, %p2893_p2 }
0x2487   :  { %v2741_v4 = vpop.eup %2740 }
0x2488   :  { %v1864_v18 = vmul.f32 %v2741_v4, %v1862_v17 }
0x24e8   :  { %v1867_v29 = vpop.permute.xlu0 %1866 }
0x24e9   :  { %v1869_v12 = vmul.f32 %v2741_v4, %v1867_v29 }
0x24eb   :  { %1871 = vrot.lane.b32.xlu1 %v1869_v12, %s2936_s4 }
0x255d   :  { %v1872_v6 = vpop.permute.xlu1 %1871 }
0x255e   :  { %v1874_v19 = vadd.f32 %v1872_v6, %v1864_v18 }
0x2560   :  { %2742 = vtanh.f32 %v1874_v19  ;;  %v1973_v38 = vrot.slane %v1874_v19, 7 }
0x256d   :  { %v2743_v20 = vpop.eup %2742 }
0x256e   :  { %1877 = vrot.lane.b32.xlu0 %v2743_v20, %s2935_s16 }
0x25e0   :  { %v1878_v7 = vpop.permute.xlu0 %1877 }
0x25e1   :  { %v1880_v21 = vmul.f32 %v2741_v4, %v1878_v7 }
0x25e3   :  { %v1886_v9 = vrot.slane %v1880_v21, 5 }
0x25e5   :  { %1887 = vrot.lane.b32.xlu1 %v1886_v9, %s2936_s4 }
0x2657   :  { %v1888_v23 = vpop.permute.xlu1 %1887 }
0x2658   :  { %2594 = vmatmul.mubr.msk.f32.vlgmr.msra.gmra.mxu1 %vm259_vm2, %v1888_v23 }
0x2659   :  { %2615 = vmatprep.mubr.msk.f32.mxu1 %vm2934_vm0, %v2933_v1 }
0x2718   :  { %v1957_v24 = vpop.f32.mrf.mxu1 }
0x2719   :  { %v1962_v25 = vrot.slane %v1957_v24, 2 }
0x271a   :  { %v2595_v27 = vpop.f32.mrf.mxu1 }
0x271b   :  { %v1964_v28 = vadd.f32 %v1962_v25, %v3296_v26 }
0x271d   :  { %2744 = vtanh.f32 %v1964_v28  ;;  %v2273_v31 = vmul.f32 -1.442695, %v1964_v28 }
0x271f   :  { %2746 = vpow2.f32 %v2273_v31 }
0x272a   :  { %v2745_v30 = vpop.eup %2744 }
0x272b   :  { %1977 = vrot.lane.b32.xlu0 %v2745_v30, %s2935_s16 }
0x272c   :  { %v2747_v32 = vpop.eup %2746 }
0x272d   :  { %v1968_v33 = vadd.f32 1.0, %v2747_v32 }
0x272f   :  { %2748 = vrcp.f32 %v1968_v33 }
0x273c   :  { %v2749_v35 = vpop.eup %2748 }
0x273d   :  { %v1975_v39 = vmul.f32 %v2749_v35, %v1973_v38 }
0x279d   :  { %v1978_v36 = vpop.permute.xlu0 %1977 }
0x279e   :  { %v1980_v37 = vmul.f32 %v2749_v35, %v1978_v36 }
0x27a0   :  { %1982 = vrot.lane.b32.xlu1 %v1980_v37, %s2936_s4 }
0x2812   :  { %v1983_v40 = vpop.permute.xlu1 %1982 }
0x2813   :  { %v1985_v41 = vadd.f32 %v1983_v40, %v1975_v39 }
0x2815   :  { %2750 = vtanh.f32 %v1985_v41 }
0x2822   :  { %v2751_v42 = vpop.eup %2750 }
0x2823   :  { %1988 = vrot.lane.b32.xlu0 %v2751_v42, %s2935_s16 }
0x2895   :  { %v1989_v43 = vpop.permute.xlu0 %1988 }
0x2896   :  { %v1991_v45 = vmul.f32 %v2749_v35, %v1989_v43 }
0x2898   :  { %v1997_v46 = vrot.slane %v1991_v45, 6 }
0x289a   :  { %1998 = vrot.lane.b32.xlu1 %v1997_v46, %s2936_s4 }
0x290c   :  { %v1999_v47 = vpop.permute.xlu1 %1998 }
0x290d   :  { %2605 = vmatmul.mubr.msk.f32.vlgmr.msra.gmra.mxu0 %vm259_vm2, %v1999_v47 }
0x29cd   :  { %v2068_v48 = vpop.f32.mrf.mxu0 }
0x29ce   :  { %v2073_v49 = vrot.slane %v2068_v48, 1 }
0x29cf   :  { %v2606_v51 = vpop.f32.mrf.mxu0 }
0x29d0   :  { %v2075_v52 = vadd.f32 %v2073_v49, %v3296_v26  ;;  %v2084_v26 = vrot.slane %v1985_v41, 7 }
0x29d2   :  { %2752 = vtanh.f32 %v2075_v52  ;;  %v2275_v54 = vmul.f32 -1.442695, %v2075_v52 }
0x29d4   :  { %2754 = vpow2.f32 %v2275_v54 }
0x29df   :  { %v2753_v53 = vpop.eup %2752 }
0x29e0   :  { %2088 = vrot.lane.b32.xlu0 %v2753_v53, %s2935_s16 }
0x29e1   :  { %v2755_v55 = vpop.eup %2754 }
0x29e2   :  { %v2079_v56 = vadd.f32 1.0, %v2755_v55 }
0x29e4   :  { %2756 = vrcp.f32 %v2079_v56 }
0x29f1   :  { %v2757_v57 = vpop.eup %2756 }
0x29f2   :  { %v2086_v60 = vmul.f32 %v2757_v57, %v2084_v26 }
0x2a52   :  { %v2089_v58 = vpop.permute.xlu0 %2088 }
0x2a53   :  { %v2091_v59 = vmul.f32 %v2757_v57, %v2089_v58 }
0x2a55   :  { %2093 = vrot.lane.b32.xlu1 %v2091_v59, %s2936_s4 }
0x2a59   :  { %1438 = vrot.lane.b32.xlu1 %v3319_v63, %s2936_s4 }
0x2a5d   :  { %1660 = vrot.lane.b32.xlu1 %v3357_v44, %s2936_s4  ;;  %v2112_v44 = vld [vmem:[#allocation16 + $0x18] sm:$0xff] }
0x2a5e   :  { %2608 = vmatpush3.msra.mxu1 %v2112_v44 }
0x2a5f   :  { %2609 = vmatprep.subr.mxu1 %v2933_v1 }
0x2a60   :  { %2610 = vmatpush3.msra.mxu1 %v2111_v5 }
0x2a61   :  { %1882 = vrot.lane.b32.xlu1 %v1880_v21, %s2936_s4  ;;  %2611 = vmatprep.subr.mxu1 %v2933_v1 }
0x2a62   :  { %2612 = vmatpush3.msra.mxu1 %v2110_v10 }
0x2a63   :  { %2613 = vmatprep.subr.mxu1 %v2933_v1  ;;  %v2194_v1 = vlaneseq }
0x2a64   :  { %2614 = vmatpush3.msra.mxu1 %v2109_v11 }
0x2a65   :  { %v2195_v4 = vand.u32 127, %v2194_v1 }
0x2a67   :  { %vm2196_vm10 = vcmp.lt.s32.totalorder %v2195_v4, 64 }
0x2ac7   :  { %v2094_v61 = vpop.permute.xlu1 %2093 }
0x2ac8   :  { %v2096_v62 = vadd.f32 %v2094_v61, %v2086_v60 }
0x2aca   :  { %2758 = vtanh.f32 %v2096_v62 }
0x2acb   :  { %v1439_v0 = vpop.permute.xlu1 %1438 }
0x2acc   :  { %1441 = vst.msk [vmem:[#allocation4] sm:$0x2] %vm471_vm3, %v1439_v0 }
0x2acf   :  { %v1661_v34 = vpop.permute.xlu1 %1660 }
0x2ad0   :  { %1663 = vst.msk [vmem:[#allocation4] sm:$0x8] %vm695_vm4, %v1661_v34 }
0x2ad3   :  { %v1883_v3 = vpop.permute.xlu1 %1882 }
0x2ad4   :  { %1885 = vst.msk [vmem:[#allocation4] sm:$0x20] %vm919_vm5, %v1883_v3 }
0x2ad7   :  { %v2759_v63 = vpop.eup %2758 }
0x2ad8   :  { %2099 = vrot.lane.b32.xlu0 %v2759_v63, %s2935_s16 }
0x2adc   :  { %1549 = vrot.lane.b32.xlu0 %v3338_v22, %s2936_s4 }
0x2ae0   :  { %1771 = vrot.lane.b32.xlu0 %v3376_v2, %s2936_s4 }
0x2ae4   :  { %1993 = vrot.lane.b32.xlu0 %v1991_v45, %s2936_s4 }
0x2b4a   :  { %v2100_v22 = vpop.permute.xlu0 %2099 }
0x2b4b   :  { %v2102_v8 = vmul.f32 %v2757_v57, %v2100_v22 }
0x2b4d   :  { %2104 = vrot.lane.b32.xlu1 %v2102_v8, %s2936_s4 }
0x2b4e   :  { %v1550_v2 = vpop.permute.xlu0 %1549 }
0x2b4f   :  { %1552 = vst.msk [vmem:[#allocation4] sm:$0x4] %vm583_vm6, %v1550_v2 }
0x2b52   :  { %v1772_v14 = vpop.permute.xlu0 %1771 }
0x2b53   :  { %1774 = vst.msk [vmem:[#allocation4] sm:$0x10] %vm807_vm7, %v1772_v14 }
0x2b56   :  { %v1994_v50 = vpop.permute.xlu0 %1993 }
0x2b57   :  { %1996 = vst.msk [vmem:[#allocation4] sm:$0x40] %vm1031_vm8, %v1994_v50 }
0x2bbf   :  { %v2105_v13 = vpop.permute.xlu1 %2104 }
0x2bc0   :  { %2107 = vst.msk [vmem:[#allocation4] sm:$0x80] %vm1143_vm9, %v2105_v13 }
0x2bc7   :  { %v2108_v16 = vld [vmem:[#allocation4] sm:$0xff] }
0x2bc8   :  { %2616 = vmatmul.mubr.msk.f32.vlgmr.msra.gmra.mxu1 %vm259_vm2, %v2108_v16 }
0x2c88   :  { %v2189_v29 = vpop.f32.mrf.mxu1 }
0x2c89   :  { %v2190_v12 = vadd.f32 %v2276_v15, %v2189_v29 }
0x2c8a   :  { %v2617_v17 = vpop.f32.mrf.mxu1 }
0x2c8b   :  { %v2193_v18 = vmax.f32 %v2190_v12, 0.0 }
0x2c8d   :  { %v2197_v6 = vsel %vm2196_vm10, %v2193_v18, -1e+30 }
0x2c8e   :  { %2198 = vmax.xlane.f32.xlu0 %v2197_v6 }
0x2d17   :  { %v2199_v19 = vpop.xlane.xlu0 %2198 }
0x2d18   :  { %v2200_v20 = vsub.f32 %v2197_v6, %v2199_v19 }
0x2d1a   :  { %v2201_v7 = vmul.f32 1.442695, %v2200_v20 }
0x2d1c   :  { %2760 = vpow2.f32 %v2201_v7 }
0x2d29   :  { %v2761_v21 = vpop.eup %2760 }
0x2d2a   :  { %2203 = vadd.xlane.f32.xlu1 %v2761_v21 }
0x2db3   :  { %v2204_v9 = vpop.xlane.xlu1 %2203 }
0x2db4   :  { %2762 = vlog2.f32 %v2204_v9 }
0x2dc1   :  { %v2763_v23 = vpop.eup %2762 }
0x2dc2   :  { %v2206_v24 = vmul.f32 0.6931472, %v2763_v23 }
0x2dc4   :  { %v2207_v25 = vsub.f32 %v2200_v20, %v2206_v24 }
0x2dc6   :  { %2208 = vst [vmem:[#allocation18] sm:$0xff] %v2207_v25 }
0x2dc7   :  { %2903 = shalt.err (!%p2900_p6)
}
0x2dc8   :  { %2218 = dma.vmem_to_hbm [thread:$0]  %s2216_s22, 128, %s3446_s10, [#allocation7]  }
0x2dc9   :  { %2922 = dma.done.wait [#allocation7], 128  }
0x2dca   :  { %2923 = vsyncadd [#allocation7], 4294967168 }
0x2dcb   :  { %2222 = vsyncpa [#allocation6], 1 }
0x2dcc   :  { %2223 = vsyncpa [#allocation11], 1 }
0x2dcd   :  { %2224 = vsyncpa [#allocation14], 1 }
0x2dce   :  { %2225 = vsyncpa [#allocation17], 1 }
0x2dcf   :  { %2226 = vsyncpa [#allocation7], 1 }
0x2dd0   :  { %2227 = vsyncpa [#allocation8], 1 }

</bundles_post_ra>
